<compile_context>
chip_gen: v6e
topology: v6e:2x2x1
jax: 0.10.0
libtpu: 0.0.40
codegen_flags: <defaults>
</compile_context>

<pallas_src>
import jax
import jax.numpy as jnp
from jax.experimental import pallas as pl
from jax.experimental.pallas import tpu as pltpu

LANE = 128
_MAX_TM = 1024


def _round_up(n, m):
    return ((n + m - 1) // m) * m


def _mlp_kernel(x_ref, w1_ref, b1_ref, w2_ref, b2_ref, w3_ref, b3_ref, o_ref):
    # x tile arrives in its original dtype (f32); cast to bf16 in-kernel (the
    # VPU has slack, and this halves HBM bytes vs. a wrapper-side cast+copy).
    x = x_ref[...].astype(jnp.bfloat16)
    h1 = jnp.dot(x, w1_ref[...], preferred_element_type=jnp.float32)
    h1 = jnp.maximum(h1 + b1_ref[...], 0.0)
    h2 = jnp.dot(h1.astype(jnp.bfloat16), w2_ref[...],
                 preferred_element_type=jnp.float32)
    h2 = jnp.maximum(h2 + b2_ref[...], 0.0)
    h3 = jnp.dot(h2.astype(jnp.bfloat16), w3_ref[...],
                 preferred_element_type=jnp.float32)
    # NOTE: ReLU after the final Linear is intentional — it matches the spec.
    o_ref[...] = jnp.maximum(h3 + b3_ref[...], 0.0).astype(o_ref.dtype)


def _mlp_kernel_feat(x_ref, w1_ref, b1_ref, w2_ref, b2_ref, w3_ref, b3_ref,
                     o_ref, feat_ref):
    x = x_ref[...].astype(jnp.bfloat16)
    h1 = jnp.dot(x, w1_ref[...], preferred_element_type=jnp.float32)
    h1 = jnp.maximum(h1 + b1_ref[...], 0.0)
    h2 = jnp.dot(h1.astype(jnp.bfloat16), w2_ref[...],
                 preferred_element_type=jnp.float32)
    h2 = jnp.maximum(h2 + b2_ref[...], 0.0)
    feat_ref[...] = h2.astype(feat_ref.dtype)
    h3 = jnp.dot(h2.astype(jnp.bfloat16), w3_ref[...],
                 preferred_element_type=jnp.float32)
    o_ref[...] = jnp.maximum(h3 + b3_ref[...], 0.0).astype(o_ref.dtype)


def prepare_params(params):
    """One-time repack of the Linear params for the kernel: weights -> bf16
    (MXU-native), biases -> f32 rows, class dim padded to a lane multiple.
    Call once and reuse — doing this per forward pass is pure HBM overhead."""
    w1, b1, w2, b2, w3, b3 = params
    class_num = w3.shape[1]
    cp = _round_up(class_num, LANE)
    w3_p = jnp.zeros((w3.shape[0], cp), jnp.bfloat16).at[:, :class_num].set(
        w3.astype(jnp.bfloat16))
    b3_p = jnp.zeros((1, cp), jnp.float32).at[:, :class_num].set(
        jnp.asarray(b3, jnp.float32).reshape(1, -1))
    return dict(
        w1=w1.astype(jnp.bfloat16),
        b1=jnp.asarray(b1, jnp.float32).reshape(1, -1),
        w2=w2.astype(jnp.bfloat16),
        b2=jnp.asarray(b2, jnp.float32).reshape(1, -1),
        w3=w3_p,
        b3=b3_p,
        class_num=class_num,
    )


def _batch_tiling(B):
    """Pick (TM, padded_B).  Prefers no batch padding, and >=2 grid steps when
    the batch is big enough to keep both v7x TensorCores busy."""
    if B <= _MAX_TM:
        if B >= 64 and B % 16 == 0:
            return B // 2, B          # two tiles, no padding (2 TCs busy)
        return B, B                   # single tile; block dim == full array dim
    for tm in (1024, 512, 256):       # large batch: biggest clean divisor tile
        if B % tm == 0:
            return tm, B
    return _MAX_TM, _round_up(B, _MAX_TM)


def mlp_forward(x, prepared, return_feat=False):
    """x: (B, ...) flattening to 784 features.  Returns post-ReLU
    (B, class_num) logits; with return_feat=True also the (B, 256) features."""
    w1, b1 = prepared["w1"], prepared["b1"]
    w2, b2 = prepared["w2"], prepared["b2"]
    w3, b3 = prepared["w3"], prepared["b3"]
    class_num = prepared["class_num"]

    B = x.shape[0]
    x2d = x.reshape(B, -1)                      # same as torch .view(B, -1)
    K1 = w1.shape[0]
    assert x2d.shape[1] == K1, "expected 784 flattened features"
    feat_dim = w2.shape[1]
    cp = w3.shape[1]                            # class dim already lane-padded

    TM, Bp = _batch_tiling(B)
    if Bp != B:                                 # pad rows only when TM !| B
        x2d = jnp.pad(x2d, ((0, Bp - B), (0, 0)))
    grid = (Bp // TM,)

    def resident(shape):
        # Constant block index -> DMA'd once, stays resident in VMEM.
        return pl.BlockSpec(shape, lambda i: (0, 0))

    in_specs = [
        pl.BlockSpec((TM, K1), lambda i: (i, 0)),   # pipelined activation tile
        resident(w1.shape), resident(b1.shape),
        resident(w2.shape), resident(b2.shape),
        resident(w3.shape), resident(b3.shape),
    ]
    out_tile = pl.BlockSpec((TM, cp), lambda i: (i, 0))
    compiler_params = pltpu.CompilerParams(
        dimension_semantics=("parallel",),      # batch axis shards over v7x TCs
        vmem_limit_bytes=32 << 20,              # headroom for TM=1024 tiles
    )

    if return_feat:
        out, feat = pl.pallas_call(
            _mlp_kernel_feat,
            out_shape=(jax.ShapeDtypeStruct((Bp, cp), jnp.float32),
                       jax.ShapeDtypeStruct((Bp, feat_dim), jnp.float32)),
            grid=grid,
            in_specs=in_specs,
            out_specs=(out_tile, pl.BlockSpec((TM, feat_dim), lambda i: (i, 0))),
            compiler_params=compiler_params,
        )(x2d, w1, b1, w2, b2, w3, b3)
        return out[:B, :class_num], feat[:B]

    out = pl.pallas_call(
        _mlp_kernel,
        out_shape=jax.ShapeDtypeStruct((Bp, cp), jnp.float32),
        grid=grid,
        in_specs=in_specs,
        out_specs=out_tile,
        compiler_params=compiler_params,
    )(x2d, w1, b1, w2, b2, w3, b3)
    return out[:B, :class_num]


def init_params(key, class_num):
    """PyTorch nn.Linear-style init (U[-1/sqrt(fan_in), 1/sqrt(fan_in)]).
    Weights stored as (in_features, out_features); biases as (1, out)."""
    dims = [(784, 512), (512, 256), (256, class_num)]
    params = []
    for (fan_in, fan_out) in dims:
        key, kw, kb = jax.random.split(key, 3)
        bound = 1.0 / (fan_in ** 0.5)
        w = jax.random.uniform(kw, (fan_in, fan_out), jnp.float32, -bound, bound)
        b = jax.random.uniform(kb, (1, fan_out), jnp.float32, -bound, bound)
        params += [w, b]
    return tuple(params)


if __name__ == "__main__":
    key = jax.random.PRNGKey(0)
    class_num = 10
    k_x, k_p = jax.random.split(key)

    # MNIST-like input: (B, C, H, W) = (2, 1, 28, 28) -> 784 flattened features.
    x = jax.random.normal(k_x, (2, 1, 28, 28), jnp.float32)
    params = init_params(k_p, class_num)
    prepared = prepare_params(params)           # one-time weight repack

    out = mlp_forward(x, prepared)
    jax.block_until_ready(out)
    assert out.shape == (2, class_num)

    logits, feat = mlp_forward(x, prepared, return_feat=True)
    jax.block_until_ready((logits, feat))
    assert logits.shape == (2, class_num) and feat.shape == (2, 256)

    w1, b1, w2, b2, w3, b3 = params
    xf = x.reshape(x.shape[0], -1)

    # Exact-path reference: same bf16 operand quantization, f32 accumulation.
    def bf16_layer(a, w, b):
        return jnp.maximum(
            jnp.dot(a.astype(jnp.bfloat16), w.astype(jnp.bfloat16),
                    preferred_element_type=jnp.float32) + b, 0.0)

    h1 = bf16_layer(xf, w1, b1)
    h2 = bf16_layer(h1, w2, b2)
    ref_b = bf16_layer(h2, w3, b3)
    assert jnp.allclose(out, ref_b, atol=2e-3, rtol=2e-3)
    assert jnp.allclose(logits, ref_b, atol=2e-3, rtol=2e-3)
    assert jnp.allclose(feat, h2, atol=2e-3, rtol=2e-3)

    # Semantic (full f32) reference with loose tolerance for the bf16 matmuls.
    ref = jnp.maximum(xf @ w1 + b1, 0.0)
    ref = jnp.maximum(ref @ w2 + b2, 0.0)
    ref = jnp.maximum(ref @ w3 + b3, 0.0)
    assert jnp.allclose(out, ref, atol=5e-2, rtol=5e-2)

    print("KERNEL_OK")
</pallas_src>

<mosaic_0001>
module attributes {stable_mosaic.version = 11 : i64} {
  func.func @_mlp_kernel(%arg0: i32, %arg1: memref<2x784xf32, #tpu.memory_space<vmem>>, %arg2: memref<784x512xbf16, #tpu.memory_space<vmem>>, %arg3: memref<1x512xf32, #tpu.memory_space<vmem>>, %arg4: memref<512x256xbf16, #tpu.memory_space<vmem>>, %arg5: memref<1x256xf32, #tpu.memory_space<vmem>>, %arg6: memref<256x128xbf16, #tpu.memory_space<vmem>>, %arg7: memref<1x128xf32, #tpu.memory_space<vmem>>, %arg8: memref<2x128xf32, #tpu.memory_space<vmem>>) attributes {dimension_semantics = [#tpu.dimension_semantics<parallel>], iteration_bounds = array<i64: 1>, scalar_prefetch = 0 : i64, scratch_operands = 0 : i64, tpu.core_type = #tpu.core_type<tc>, window_params = [{transform_indices = @transform_0, window_bounds = array<i64: 2, 784>}, {pipeline_mode = #tpu.pipeline_mode<synchronous>, transform_indices = @transform_1, window_bounds = array<i64: 784, 512>}, {pipeline_mode = #tpu.pipeline_mode<synchronous>, transform_indices = @transform_2, window_bounds = array<i64: 1, 512>}, {pipeline_mode = #tpu.pipeline_mode<synchronous>, transform_indices = @transform_3, window_bounds = array<i64: 512, 256>}, {pipeline_mode = #tpu.pipeline_mode<synchronous>, transform_indices = @transform_4, window_bounds = array<i64: 1, 256>}, {pipeline_mode = #tpu.pipeline_mode<synchronous>, transform_indices = @transform_5, window_bounds = array<i64: 256, 128>}, {pipeline_mode = #tpu.pipeline_mode<synchronous>, transform_indices = @transform_6, window_bounds = array<i64: 1, 128>}, {transform_indices = @transform_7, window_bounds = array<i64: 2, 128>}]} {
    %c0 = arith.constant 0 : index
    %c0_0 = arith.constant 0 : index
    %0 = vector.load %arg1[%c0, %c0_0] : memref<2x784xf32, #tpu.memory_space<vmem>>, vector<2x784xf32>
    %1 = arith.truncf %0 : vector<2x784xf32> to vector<2x784xbf16>
    %c0_1 = arith.constant 0 : index
    %c0_2 = arith.constant 0 : index
    %2 = vector.load %arg2[%c0_1, %c0_2] : memref<784x512xbf16, #tpu.memory_space<vmem>>, vector<784x512xbf16>
    %cst = arith.constant dense<0.000000e+00> : vector<2x512xf32>
    %3 = tpu.matmul %1, %2, %cst {dimension_numbers = #tpu.dot_dimension_numbers<[1], [0], [0], [1], [0, 0, 1, 1], [], []>} : vector<2x784xbf16>, vector<784x512xbf16>, vector<2x512xf32> -> vector<2x512xf32>
    %c0_3 = arith.constant 0 : index
    %c0_4 = arith.constant 0 : index
    %4 = vector.load %arg3[%c0_3, %c0_4] : memref<1x512xf32, #tpu.memory_space<vmem>>, vector<1x512xf32>
    %5 = vector.broadcast %4 : vector<1x512xf32> to vector<2x512xf32>
    %6 = arith.addf %3, %5 : vector<2x512xf32>
    %cst_5 = arith.constant 0.000000e+00 : f32
    %7 = vector.broadcast %cst_5 : f32 to vector<2x512xf32>
    %8 = arith.maximumf %6, %7 : vector<2x512xf32>
    %9 = arith.truncf %8 : vector<2x512xf32> to vector<2x512xbf16>
    %c0_6 = arith.constant 0 : index
    %c0_7 = arith.constant 0 : index
    %10 = vector.load %arg4[%c0_6, %c0_7] : memref<512x256xbf16, #tpu.memory_space<vmem>>, vector<512x256xbf16>
    %cst_8 = arith.constant dense<0.000000e+00> : vector<2x256xf32>
    %11 = tpu.matmul %9, %10, %cst_8 {dimension_numbers = #tpu.dot_dimension_numbers<[1], [0], [0], [1], [0, 0, 1, 1], [], []>} : vector<2x512xbf16>, vector<512x256xbf16>, vector<2x256xf32> -> vector<2x256xf32>
    %c0_9 = arith.constant 0 : index
    %c0_10 = arith.constant 0 : index
    %12 = vector.load %arg5[%c0_9, %c0_10] : memref<1x256xf32, #tpu.memory_space<vmem>>, vector<1x256xf32>
    %13 = vector.broadcast %12 : vector<1x256xf32> to vector<2x256xf32>
    %14 = arith.addf %11, %13 : vector<2x256xf32>
    %cst_11 = arith.constant 0.000000e+00 : f32
    %15 = vector.broadcast %cst_11 : f32 to vector<2x256xf32>
    %16 = arith.maximumf %14, %15 : vector<2x256xf32>
    %17 = arith.truncf %16 : vector<2x256xf32> to vector<2x256xbf16>
    %c0_12 = arith.constant 0 : index
    %c0_13 = arith.constant 0 : index
    %18 = vector.load %arg6[%c0_12, %c0_13] : memref<256x128xbf16, #tpu.memory_space<vmem>>, vector<256x128xbf16>
    %cst_14 = arith.constant dense<0.000000e+00> : vector<2x128xf32>
    %19 = tpu.matmul %17, %18, %cst_14 {dimension_numbers = #tpu.dot_dimension_numbers<[1], [0], [0], [1], [0, 0, 1, 1], [], []>} : vector<2x256xbf16>, vector<256x128xbf16>, vector<2x128xf32> -> vector<2x128xf32>
    %c0_15 = arith.constant 0 : index
    %c0_16 = arith.constant 0 : index
    %20 = vector.load %arg7[%c0_15, %c0_16] : memref<1x128xf32, #tpu.memory_space<vmem>>, vector<1x128xf32>
    %21 = vector.broadcast %20 : vector<1x128xf32> to vector<2x128xf32>
    %22 = arith.addf %19, %21 : vector<2x128xf32>
    %cst_17 = arith.constant 0.000000e+00 : f32
    %23 = vector.broadcast %cst_17 : f32 to vector<2x128xf32>
    %24 = arith.maximumf %22, %23 : vector<2x128xf32>
    %c0_18 = arith.constant 0 : index
    %c0_19 = arith.constant 0 : index
    %25 = vector.load %arg8[%c0_18, %c0_19] : memref<2x128xf32, #tpu.memory_space<vmem>>, vector<2x128xf32>
    tpu.vector_store %arg8[%c0_18, %c0_19], %24 {strides = array<i32>} : memref<2x128xf32, #tpu.memory_space<vmem>>, vector<2x128xf32>,
    return
  }
  func.func @transform_0(%arg0: i32) -> (i32, i32) {
    %c0_i32 = arith.constant 0 : i32
    %c0_i32_0 = arith.constant 0 : i32
    return %arg0, %c0_i32 : i32, i32
  }
  func.func @transform_1(%arg0: i32) -> (i32, i32) {
    %c0_i32 = arith.constant 0 : i32
    %c0_i32_0 = arith.constant 0 : i32
    %c0_i32_1 = arith.constant 0 : i32
    return %c0_i32, %c0_i32_0 : i32, i32
  }
  func.func @transform_2(%arg0: i32) -> (i32, i32) {
    %c0_i32 = arith.constant 0 : i32
    %c0_i32_0 = arith.constant 0 : i32
    %c0_i32_1 = arith.constant 0 : i32
    return %c0_i32, %c0_i32_0 : i32, i32
  }
  func.func @transform_3(%arg0: i32) -> (i32, i32) {
    %c0_i32 = arith.constant 0 : i32
    %c0_i32_0 = arith.constant 0 : i32
    %c0_i32_1 = arith.constant 0 : i32
    return %c0_i32, %c0_i32_0 : i32, i32
  }
  func.func @transform_4(%arg0: i32) -> (i32, i32) {
    %c0_i32 = arith.constant 0 : i32
    %c0_i32_0 = arith.constant 0 : i32
    %c0_i32_1 = arith.constant 0 : i32
    return %c0_i32, %c0_i32_0 : i32, i32
  }
  func.func @transform_5(%arg0: i32) -> (i32, i32) {
    %c0_i32 = arith.constant 0 : i32
    %c0_i32_0 = arith.constant 0 : i32
    %c0_i32_1 = arith.constant 0 : i32
    return %c0_i32, %c0_i32_0 : i32, i32
  }
  func.func @transform_6(%arg0: i32) -> (i32, i32) {
    %c0_i32 = arith.constant 0 : i32
    %c0_i32_0 = arith.constant 0 : i32
    %c0_i32_1 = arith.constant 0 : i32
    return %c0_i32, %c0_i32_0 : i32, i32
  }
  func.func @transform_7(%arg0: i32) -> (i32, i32) {
    %c0_i32 = arith.constant 0 : i32
    %c0_i32_0 = arith.constant 0 : i32
    return %arg0, %c0_i32 : i32, i32
  }
}

</mosaic_0001>

<bundles_post_ra>
// kernel: tpu_custom_call.1
= control target key start
LH: loop header
LB: loop body
LE: loop exit
PB: predicated region body
PF: predicated region fallthrough
CT: control target
= control target key end

     0   :  { %12 = vsyncpa [#allocation3], 0  ;;  %s3345_s0 = inlined_call_operand.hbm [shape: f32[2,784], index: 0, kind: input, shape index: {}]   ;;  %s3346_s1 = inlined_call_operand.hbm [shape: bf16[784,512], index: 1, kind: input, shape index: {}]   ;;  %s3347_s2 = inlined_call_operand.hbm [shape: f32[1,512], index: 2, kind: input, shape index: {}]   ;;  %s3348_s3 = inlined_call_operand.hbm [shape: bf16[512,256], index: 3, kind: input, shape index: {}]   ;;  %s3349_s4 = inlined_call_operand.vmem [shape: f32[1,256], index: 4, kind: input, shape index: {}]   ;;  %s3350_s5 = inlined_call_operand.hbm [shape: bf16[256,128], index: 5, kind: input, shape index: {}]   ;;  %s3351_s6 = inlined_call_operand.vmem [shape: f32[1,128], index: 6, kind: input, shape index: {}]   ;;  %s3352_s7 = inlined_call_operand.hbm [shape: f32[2,128], index: 7, kind: output, shape index: {}]  }
   0x1   :  { %13 = vsyncpa [#allocation6], 0 }
   0x2   :  { %14 = vsyncpa [#allocation9], 0 }
   0x3   :  { %15 = vsyncpa [#allocation4], 0  ;;  %s3208_s24 = smov [#allocation5]  }
   0x4   :  { %s31_s25 = sshll.u32 %s3208_s24, 4  ;;  %s32_s25 = int_to_ptr.vmem [resolvable:$true] %s31_s25 }
   0x5   :  { %s3088_s26 = scalar_lea.vmem %s32_s25, 25088  ;;  %p3093_p1 = scmp.lt.s32.totalorder %s32_s25, %s32_s25 }
   0x6   :  { %p3089_p0 = scmp.ne.s32.totalorder %s32_s25, %s3088_s26  ;;  %p3094_p2 = scmp.lt.s32.totalorder %s3088_s26, %s3088_s26 }
   0x8   :  { %p3095_p3 = por %p3094_p2, %p3093_p1 }
   0xa   :  { %p3096_p4 = pnand %p3095_p3, %p3089_p0 }
   0xc   :  { %3099 = shalt.err (!%p3096_p4)
}
   0xd   :  { %s3209_s27 = smov 256   ;;  %s3210_s28 = smov 16  }
   0xe   :  { %37 = dma.hbm_to_vmem [thread:$0]  %s3346_s1, 25088, %s32_s25, [#allocation6], %s3209_s27, %s3209_s27, %s3210_s28  }
   0xf   :  { %s3211_s8 = smov [#allocation8]  }
  0x10   :  { %s53_s9 = sshll.u32 %s3211_s8, 4  ;;  %s54_s9 = int_to_ptr.vmem [resolvable:$true] %s53_s9 }
  0x11   :  { %s3108_s10 = scalar_lea.vmem %s54_s9, 8192  ;;  %p3113_p6 = scmp.lt.s32.totalorder %s54_s9, %s54_s9 }
  0x12   :  { %p3109_p5 = scmp.ne.s32.totalorder %s54_s9, %s3108_s10  ;;  %p3114_p7 = scmp.lt.s32.totalorder %s3108_s10, %s3108_s10 }
  0x14   :  { %p3115_p8 = por %p3114_p7, %p3113_p6 }
  0x16   :  { %p3116_p9 = pnand %p3115_p8, %p3109_p5 }
  0x18   :  { %3119 = shalt.err (!%p3116_p9)
}
  0x19   :  { %s3212_s11 = smov 128   ;;  %s3213_s12 = smov 8  }
  0x1a   :  { %59 = dma.hbm_to_vmem [thread:$0]  %s3348_s3, 8192, %s54_s9, [#allocation9], %s3212_s11, %s3212_s11, %s3213_s12  }
  0x1b   :  { %s3214_s15 = smov [#allocation2]   ;;  %s3215_s17 = smov [#allocation7]  }
  0x1c   :  { %s22_s16 = sshll.u32 %s3214_s15, 4  ;;  %s44_s1 = sshll.u32 %s3215_s17, 4  ;;  %s23_s16 = int_to_ptr.vmem [resolvable:$true] %s22_s16  ;;  %s45_s1 = int_to_ptr.vmem [resolvable:$true] %s44_s1 }
  0x1d   :  { %s3128_s18 = scalar_lea.vmem %s23_s16, 224  ;;  %p3133_p11 = scmp.lt.s32.totalorder %s23_s16, %s23_s16 }
  0x1e   :  { %p3129_p10 = scmp.ne.s32.totalorder %s23_s16, %s3128_s18  ;;  %p3134_p12 = scmp.lt.s32.totalorder %s3128_s18, %s3128_s18 }
  0x20   :  { %p3135_p13 = por %p3134_p12, %p3133_p11 }
  0x22   :  { %p3136_p0 = pnand %p3135_p13, %p3129_p10 }
  0x24   :  { %3139 = shalt.err (!%p3136_p0)
}
  0x25   :  { %25 = dma.hbm_to_vmem [thread:$0]  %s3345_s0, 224, %s23_s16, [#allocation3]  }
  0x26   :  { %s3148_s21 = scalar_lea.vmem %s45_s1, 64  ;;  %p3153_p2 = scmp.lt.s32.totalorder %s45_s1, %s45_s1 }
  0x27   :  { %p3149_p1 = scmp.ne.s32.totalorder %s45_s1, %s3148_s21  ;;  %p3154_p3 = scmp.lt.s32.totalorder %s3148_s21, %s3148_s21 }
  0x29   :  { %p3155_p4 = por %p3154_p3, %p3153_p2 }
  0x2b   :  { %p3156_p5 = pnand %p3155_p4, %p3149_p1 }
  0x2d   :  { %3159 = shalt.err (!%p3156_p5)
}
  0x2e   :  { %47 = dma.hbm_to_vmem [thread:$0]  %s3347_s2, 64, %s45_s1, [#allocation6]  }
  0x2f   :  { %s3216_s23 = smov [#allocation10]  }
  0x30   :  { %s67_s24 = sshll.u32 %s3216_s23, 4  ;;  %s68_s24 = int_to_ptr.vmem [resolvable:$true] %s67_s24 }
  0x31   :  { %s3168_s25 = scalar_lea.vmem %s68_s24, 2048  ;;  %p3173_p7 = scmp.lt.s32.totalorder %s68_s24, %s68_s24 }
  0x32   :  { %p3169_p6 = scmp.ne.s32.totalorder %s68_s24, %s3168_s25  ;;  %p3174_p8 = scmp.lt.s32.totalorder %s3168_s25, %s3168_s25 }
  0x34   :  { %p3175_p9 = por %p3174_p8, %p3173_p7 }
  0x36   :  { %p3176_p10 = pnand %p3175_p9, %p3169_p6 }
  0x38   :  { %3179 = shalt.err (!%p3176_p10)
}
  0x39   :  { %s3217_s0 = smov 64   ;;  %s3218_s26 = smov 4  }
  0x3a   :  { %73 = dma.hbm_to_vmem [thread:$0]  %s3350_s5, 2048, %s68_s24, [#allocation9], %s3217_s0, %s3217_s0, %s3218_s26  }
  0x3b   :  { %3200 = dma.done.wait [#allocation3], 224  }
  0x3c   :  { %3201 = vsyncadd [#allocation3], 4294967072 }
  0x3d   :  { %3202 = dma.done.wait [#allocation6], 25152  }
  0x3e   :  { %3203 = vsyncadd [#allocation6], 4294942144 }
  0x3f   :  { %3204 = dma.done.wait [#allocation9], 10240  }
  0x40   :  { %3205 = vsyncadd [#allocation9], 4294957056  ;;  %v2672_v0 = vld [vmem:[#allocation5 + $0xe4] ss:$16 sps:$4 sm:$0xff]   ;;  %v2676_v2 = vld [vmem:[#allocation5 + $0xe0] ss:$16 sps:$4 sm:$0xff]   ;;  %v100_v38 = vlaneseq }
  0x41   :  { %v2674_v1 = vld [vmem:[#allocation5 + $0x2e4] ss:$16 sps:$4 sm:$0xff]   ;;  %1345 = vmatprep.subr.bf16.mxu0 %v2672_v0  ;;  %v2677_v3 = vld [vmem:[#allocation5 + $0x2e0] ss:$16 sps:$4 sm:$0xff]   ;;  %v3219_v36 = vmov 1983009808  }
  0x42   :  { %1386 = vmatprep.subr.bf16.mxu1 %v2674_v1  ;;  %v2678_v4 = vld [vmem:[#allocation5 + $0xc4] ss:$16 sps:$4 sm:$0xff]   ;;  %1346 = vmatpush1.bf16.msra.mxu0 %v2676_v2  ;;  %v2682_v6 = vld [vmem:[#allocation5 + $0xc0] ss:$16 sps:$4 sm:$0xff]   ;;  %v98_v37 = vunpack.c.l.s4 %v3219_v36  ;;  %v3277_v43 = vshrl.u32 %v100_v38, 7  ;;  %vm1341_vm0 = vcmask 130048  }
  0x43   :  { %1387 = vmatpush1.bf16.msra.mxu1 %v2677_v3  ;;  %v2680_v5 = vld [vmem:[#allocation5 + $0x2c4] ss:$16 sps:$4 sm:$0xff]   ;;  %1347 = vmatprep.subr.bf16.mxu0 %v2678_v4  ;;  %v2683_v7 = vld [vmem:[#allocation5 + $0x2c0] ss:$16 sps:$4 sm:$0xff]   ;;  %v2785_v36 = vld [vmem:[#allocation5 + $0xc8] ss:$16 sps:$4 sm:$0xff]  }
  0x44   :  { %1388 = vmatprep.subr.bf16.mxu1 %v2680_v5  ;;  %v2684_v8 = vld [vmem:[#allocation5 + $0xa4] ss:$16 sps:$4 sm:$0xff]   ;;  %v2688_v10 = vld [vmem:[#allocation5 + $0xa0] ss:$16 sps:$4 sm:$0xff]   ;;  %v99_v42 = vunpack.c.0.s8 %v98_v37  ;;  %v2793_v38 = vld [vmem:[#allocation5 + $0xac] ss:$16 sps:$4 sm:$0xff]  }
  0x45   :  { %v2686_v9 = vld [vmem:[#allocation5 + $0x2a4] ss:$16 sps:$4 sm:$0xff]   ;;  %v2689_v11 = vld [vmem:[#allocation5 + $0x2a0] ss:$16 sps:$4 sm:$0xff]   ;;  %s3221_s30 = smov [#allocation11]  }
  0x46   :  { %1348 = vmatpush1.bf16.msra.mxu0 %v2682_v6  ;;  %v2690_v12 = vld [vmem:[#allocation5 + $0x84] ss:$16 sps:$4 sm:$0xff]   ;;  %v2694_v14 = vld [vmem:[#allocation5 + $0x80] ss:$16 sps:$4 sm:$0xff]   ;;  %v3280_v49 = vsub.s32 %v99_v42, %v3277_v43  ;;  %v2799_v42 = vld [vmem:[#allocation5 + $0x8c] ss:$16 sps:$4 sm:$0xff]  }
  0x47   :  { %1389 = vmatpush1.bf16.msra.mxu1 %v2683_v7  ;;  %1349 = vmatprep.subr.bf16.mxu0 %v2684_v8  ;;  %v2692_v13 = vld [vmem:[#allocation5 + $0x284] ss:$16 sps:$4 sm:$0xff]   ;;  %v2695_v15 = vld [vmem:[#allocation5 + $0x280] ss:$16 sps:$4 sm:$0xff]   ;;  %s2346_s8 = sshll.u32 %s3221_s30, 4  ;;  %s2347_s8 = int_to_ptr.vmem [resolvable:$true] %s2346_s8 }
  0x48   :  { %1390 = vmatprep.subr.bf16.mxu1 %v2686_v9  ;;  %v2696_v16 = vld [vmem:[#allocation5 + $0x64] ss:$16 sps:$4 sm:$0xff]   ;;  %v2700_v18 = vld [vmem:[#allocation5 + $0x60] ss:$16 sps:$4 sm:$0xff]   ;;  %s3180_s9 = scalar_lea.vmem %s2347_s8, 32  ;;  %p3185_p12 = scmp.lt.s32.totalorder %s2347_s8, %s2347_s8 }
  0x49   :  { %v2698_v17 = vld [vmem:[#allocation5 + $0x264] ss:$16 sps:$4 sm:$0xff]   ;;  %v2701_v19 = vld [vmem:[#allocation5 + $0x260] ss:$16 sps:$4 sm:$0xff]   ;;  %p3181_p11 = scmp.ne.s32.totalorder %s2347_s8, %s3180_s9  ;;  %p3186_p13 = scmp.lt.s32.totalorder %s3180_s9, %s3180_s9 }
  0x4a   :  { %1350 = vmatpush1.bf16.msra.mxu0 %v2688_v10  ;;  %v2702_v20 = vld [vmem:[#allocation5 + $0x44] ss:$16 sps:$4 sm:$0xff]   ;;  %v2706_v22 = vld [vmem:[#allocation5 + $0x40] ss:$16 sps:$4 sm:$0xff]  }
  0x4b   :  { %1391 = vmatpush1.bf16.msra.mxu1 %v2689_v11  ;;  %1351 = vmatprep.subr.bf16.mxu0 %v2690_v12  ;;  %v2704_v21 = vld [vmem:[#allocation5 + $0x244] ss:$16 sps:$4 sm:$0xff]   ;;  %v2707_v23 = vld [vmem:[#allocation5 + $0x240] ss:$16 sps:$4 sm:$0xff]   ;;  %v93_v12 = vld [vmem:[#allocation2 + $0x8] sm:$0x3f]  ;;  %p3187_p0 = por %p3186_p13, %p3185_p12 }
  0x4c   :  { %1392 = vmatprep.subr.bf16.mxu1 %v2692_v13  ;;  %v2708_v24 = vld [vmem:[#allocation5 + $0x24] ss:$16 sps:$4 sm:$0xff]   ;;  %v2712_v26 = vld [vmem:[#allocation5 + $0x20] ss:$16 sps:$4 sm:$0xff]   ;;  %v3291_v13 = vrot.slane %v93_v12, %v3280_v49 }
  0x4d   :  { %v2710_v25 = vld [vmem:[#allocation5 + $0x224] ss:$16 sps:$4 sm:$0xff]   ;;  %v2713_v27 = vld [vmem:[#allocation5 + $0x220] ss:$16 sps:$4 sm:$0xff]   ;;  %p3188_p1 = pnand %p3187_p0, %p3181_p11 }
  0x4e   :  { %1352 = vmatpush1.bf16.msra.mxu0 %v2694_v14  ;;  %v2714_v28 = vld [vmem:[#allocation5 + $0x4] ss:$16 sps:$4 sm:$0xff]   ;;  %v2718_v30 = vld [vmem:[#allocation5] ss:$16 sps:$4 sm:$0xff]  }
  0x4f   :  { %1393 = vmatpush1.bf16.msra.mxu1 %v2695_v15  ;;  %1353 = vmatprep.subr.bf16.mxu0 %v2696_v16  ;;  %v2716_v29 = vld [vmem:[#allocation5 + $0x204] ss:$16 sps:$4 sm:$0xff]   ;;  %v2719_v31 = vld [vmem:[#allocation5 + $0x200] ss:$16 sps:$4 sm:$0xff]  }
  0x50   :  { %1394 = vmatprep.subr.bf16.mxu1 %v2698_v17  ;;  %v2720_v32 = vld [vmem:[#allocation5 + $0x1e4] ss:$16 sps:$4 sm:$0xff]   ;;  %v2724_v34 = vld [vmem:[#allocation5 + $0x1e0] ss:$16 sps:$4 sm:$0xff]  }
  0x51   :  { %v2722_v33 = vld [vmem:[#allocation5 + $0x3e4] ss:$16 sps:$4 sm:$0xff]   ;;  %v2725_v35 = vld [vmem:[#allocation5 + $0x3e0] ss:$16 sps:$4 sm:$0xff]  }
  0x52   :  { %1354 = vmatpush1.bf16.msra.mxu0 %v2700_v18  ;;  %v2726_v39 = vld [vmem:[#allocation5 + $0x1c4] ss:$16 sps:$4 sm:$0xff]   ;;  %v2730_v41 = vld [vmem:[#allocation5 + $0x1c0] ss:$16 sps:$4 sm:$0xff]   ;;  %v128_v18 = vcombine.high %v3291_v13, %v3291_v13 }
  0x53   :  { %1395 = vmatpush1.bf16.msra.mxu1 %v2701_v19  ;;  %1355 = vmatprep.subr.bf16.mxu0 %v2702_v20  ;;  %v2728_v40 = vld [vmem:[#allocation5 + $0x3c4] ss:$16 sps:$4 sm:$0xff]   ;;  %v2731_v44 = vld [vmem:[#allocation5 + $0x3c0] ss:$16 sps:$4 sm:$0xff]  }
  0x54   :  { %1396 = vmatprep.subr.bf16.mxu1 %v2704_v21  ;;  %v2732_v45 = vld [vmem:[#allocation5 + $0x1a4] ss:$16 sps:$4 sm:$0xff]   ;;  %v2736_v47 = vld [vmem:[#allocation5 + $0x1a0] ss:$16 sps:$4 sm:$0xff]   ;;  %v113_v21 = vcombine.high %v93_v12, %v93_v12  ;;  %v2847_v12 = vld [vmem:[#allocation5 + $0x18c] ss:$16 sps:$4 sm:$0xff]  }
  0x55   :  { %v2734_v46 = vld [vmem:[#allocation5 + $0x3a4] ss:$16 sps:$4 sm:$0xff]   ;;  %v2737_v48 = vld [vmem:[#allocation5 + $0x3a0] ss:$16 sps:$4 sm:$0xff]  }
  0x56   :  { %1356 = vmatpush1.bf16.msra.mxu0 %v2706_v22  ;;  %v2738_v50 = vld [vmem:[#allocation5 + $0x184] ss:$16 sps:$4 sm:$0xff]   ;;  %v2742_v53 = vld [vmem:[#allocation5 + $0x180] ss:$16 sps:$4 sm:$0xff]  }
  0x57   :  { %1397 = vmatpush1.bf16.msra.mxu1 %v2707_v23  ;;  %1357 = vmatprep.subr.bf16.mxu0 %v2708_v24  ;;  %v2740_v51 = vld [vmem:[#allocation5 + $0x384] ss:$16 sps:$4 sm:$0xff]   ;;  %v2743_v56 = vld [vmem:[#allocation5 + $0x380] ss:$16 sps:$4 sm:$0xff]  }
  0x58   :  { %1398 = vmatprep.subr.bf16.mxu1 %v2710_v25  ;;  %v92_v52 = vld [vmem:[#allocation2] sm:$0xff]  ;;  %v2780_v25 = vld [vmem:[#allocation5 + $0xec] ss:$16 sps:$4 sm:$0xff]  }
  0x59   :  { %v103_v54 = vrot.slane %v92_v52, %v3280_v49  ;;  %v96_v55 = vcombine.high %v92_v52, %v92_v52  ;;  %v2744_v57 = vld [vmem:[#allocation5 + $0x164] ss:$16 sps:$4 sm:$0xff]   ;;  %v2748_v61 = vld [vmem:[#allocation5 + $0x160] ss:$16 sps:$4 sm:$0xff]  }
  0x5a   :  { %1358 = vmatpush1.bf16.msra.mxu0 %v2712_v26  ;;  %v2746_v58 = vld [vmem:[#allocation5 + $0x364] ss:$16 sps:$4 sm:$0xff]   ;;  %v2749_v0 = vld [vmem:[#allocation5 + $0x360] ss:$16 sps:$4 sm:$0xff]   ;;  %v3299_v26 = vpack.c.bf16 %v128_v18, %v128_v18 }
  0x5b   :  { %1399 = vmatpush1.bf16.msra.mxu1 %v2713_v27  ;;  %1359 = vmatprep.subr.bf16.mxu0 %v2714_v28  ;;  %v111_v59 = vcombine.high %v103_v54, %v103_v54  ;;  %v110_v60 = vrot.slane %v96_v55, %v3280_v49  ;;  %v2750_v1 = vld [vmem:[#allocation5 + $0x144] ss:$16 sps:$4 sm:$0xff]   ;;  %v2754_v4 = vld [vmem:[#allocation5 + $0x140] ss:$16 sps:$4 sm:$0xff]   ;;  %v3295_v19 = vpack.c.bf16 %v103_v54, %v103_v54  ;;  %v2817_v55 = vld [vmem:[#allocation5 + $0x2c] ss:$16 sps:$4 sm:$0xff]  }
  0x5c   :  { %1400 = vmatprep.subr.bf16.mxu1 %v2716_v29  ;;  %v2752_v2 = vld [vmem:[#allocation5 + $0x344] ss:$16 sps:$4 sm:$0xff]   ;;  %v2755_v5 = vld [vmem:[#allocation5 + $0x340] ss:$16 sps:$4 sm:$0xff]   ;;  %v127_v27 = vrot.slane %v113_v21, %v3280_v49  ;;  %v3220_v29 = vmov 0  }
  0x5d   :  { %v3284_v62 = vpack.c.bf16 %v111_v59, %v111_v59  ;;  %v112_v63 = vcombine.high %v110_v60, %v110_v60  ;;  %v2756_v6 = vld [vmem:[#allocation5 + $0x124] ss:$16 sps:$4 sm:$0xff]   ;;  %v2760_v8 = vld [vmem:[#allocation5 + $0x120] ss:$16 sps:$4 sm:$0xff]   ;;  %v3297_v20 = vpack.c.bf16 %v110_v60, %v110_v60  ;;  %v2803_v49 = vld [vmem:[#allocation5 + $0x68] ss:$16 sps:$4 sm:$0xff]  }
  0x5e   :  { %1360 = vmatpush1.bf16.msra.mxu0 %v2718_v30  ;;  %v2758_v7 = vld [vmem:[#allocation5 + $0x324] ss:$16 sps:$4 sm:$0xff]   ;;  %v2761_v9 = vld [vmem:[#allocation5 + $0x320] ss:$16 sps:$4 sm:$0xff]   ;;  %v2823_v59 = vld [vmem:[#allocation5 + $0xc] ss:$16 sps:$4 sm:$0xff]  }
  0x5f   :  { %1401 = vmatpush1.bf16.msra.mxu1 %v2719_v31  ;;  %1361 = vmatprep.subr.bf16.mxu0 %v2720_v32  ;;  %v3286_v3 = vpack.c.bf16 %v112_v63, %v112_v63  ;;  %v2762_v10 = vld [vmem:[#allocation5 + $0x104] ss:$16 sps:$4 sm:$0xff]   ;;  %v2766_v14 = vld [vmem:[#allocation5 + $0x100] ss:$16 sps:$4 sm:$0xff]   ;;  %v3306_v31 = vpack.c.bf16 %v127_v27, %v127_v27  ;;  %v2778_v32 = vld [vmem:[#allocation5 + $0xe8] ss:$16 sps:$4 sm:$0xff]  }
  0x60   :  { %1402 = vmatprep.subr.bf16.mxu1 %v2722_v33  ;;  %1377 = vmatprep.mubr.bf16.mxu0 %v3284_v62  ;;  %v2764_v11 = vld [vmem:[#allocation5 + $0x304] ss:$16 sps:$4 sm:$0xff]   ;;  %v2767_v15 = vld [vmem:[#allocation5 + $0x300] ss:$16 sps:$4 sm:$0xff]   ;;  %v2829_v63 = vld [vmem:[#allocation5 + $0x1ec] ss:$16 sps:$4 sm:$0xff]  }
  0x61   :  { %1418 = vmatprep.mubr.bf16.mxu1 %v3286_v3  ;;  %v2771_v16 = vld [vmem:[#allocation5 + $0x4e4] ss:$16 sps:$4 sm:$0xff]   ;;  %v2769_v22 = vld [vmem:[#allocation5 + $0x4e0] ss:$16 sps:$4 sm:$0xff]   ;;  %v2851_v21 = vld [vmem:[#allocation5 + $0x168] ss:$16 sps:$4 sm:$0xff]  }
  0x62   :  { %1362 = vmatpush2.bf16.msra.mxu0 %v2724_v34  ;;  %v2774_v17 = vld [vmem:[#allocation5 + $0x604] ss:$16 sps:$4 sm:$0xff]   ;;  %v2772_v23 = vld [vmem:[#allocation5 + $0x600] ss:$16 sps:$4 sm:$0xff]   ;;  %v2787_v34 = vld [vmem:[#allocation5 + $0xcc] ss:$16 sps:$4 sm:$0xff]  }
  0x63   :  { %1403 = vmatpush2.bf16.msra.mxu1 %v2725_v35  ;;  %1363 = vmatprep.subr.bf16.mxu0 %v2726_v39  ;;  %v2777_v24 = vld [vmem:[#allocation5 + $0x4c4] ss:$16 sps:$4 sm:$0xff]   ;;  %v2775_v28 = vld [vmem:[#allocation5 + $0x4c0] ss:$16 sps:$4 sm:$0xff]  }
  0x64   :  { %1404 = vmatprep.subr.bf16.mxu1 %v2728_v40  ;;  %v2783_v30 = vld [vmem:[#allocation5 + $0x4a4] ss:$16 sps:$4 sm:$0xff]   ;;  %v2781_v33 = vld [vmem:[#allocation5 + $0x4a0] ss:$16 sps:$4 sm:$0xff]   ;;  %v2791_v40 = vld [vmem:[#allocation5 + $0xa8] ss:$16 sps:$4 sm:$0xff]  }
  0x65   :  { %v2790_v35 = vld [vmem:[#allocation5 + $0x484] ss:$16 sps:$4 sm:$0xff]   ;;  %v2788_v37 = vld [vmem:[#allocation5 + $0x480] ss:$16 sps:$4 sm:$0xff]  }
  0x66   :  { %1364 = vmatpush2.bf16.msra.mxu0 %v2730_v41  ;;  %v2796_v39 = vld [vmem:[#allocation5 + $0x464] ss:$16 sps:$4 sm:$0xff]   ;;  %v2794_v41 = vld [vmem:[#allocation5 + $0x460] ss:$16 sps:$4 sm:$0xff]  }
  0x67   :  { %1405 = vmatpush2.bf16.msra.mxu1 %v2731_v44  ;;  %1365 = vmatprep.subr.bf16.mxu0 %v2732_v45  ;;  %v2802_v44 = vld [vmem:[#allocation5 + $0x444] ss:$16 sps:$4 sm:$0xff]   ;;  %v2797_v45 = vld [vmem:[#allocation5 + $0x88] ss:$16 sps:$4 sm:$0xff]   ;;  %v2812_v54 = vld [vmem:[#allocation5 + $0x400] ss:$16 sps:$4 sm:$0xff]  }
  0x68   :  { %1406 = vmatprep.subr.bf16.mxu1 %v2734_v46  ;;  %v2800_v46 = vld [vmem:[#allocation5 + $0x440] ss:$16 sps:$4 sm:$0xff]   ;;  %v2814_v52 = vld [vmem:[#allocation5 + $0x404] ss:$16 sps:$4 sm:$0xff]  }
  0x69   :  { %v2826_v60 = vld [vmem:[#allocation5 + $0x5c4] ss:$16 sps:$4 sm:$0xff]   ;;  %v2860_v27 = vld [vmem:[#allocation5 + $0x500] ss:$16 sps:$4 sm:$0xff]  }
  0x6a   :  { %1366 = vmatpush2.bf16.msra.mxu0 %v2736_v47  ;;  %v2805_v47 = vld [vmem:[#allocation5 + $0x6c] ss:$16 sps:$4 sm:$0xff]   ;;  %v2856_v18 = vld [vmem:[#allocation5 + $0x524] ss:$16 sps:$4 sm:$0xff]  }
  0x6b   :  { %1407 = vmatpush2.bf16.msra.mxu1 %v2737_v48  ;;  %1367 = vmatprep.subr.bf16.mxu0 %v2738_v50  ;;  %v2808_v48 = vld [vmem:[#allocation5 + $0x424] ss:$16 sps:$4 sm:$0xff]   ;;  %v2806_v50 = vld [vmem:[#allocation5 + $0x420] ss:$16 sps:$4 sm:$0xff]  }
  0x6c   :  { %1408 = vmatprep.subr.bf16.mxu1 %v2740_v51  ;;  %v2811_v51 = vld [vmem:[#allocation5 + $0x4c] ss:$16 sps:$4 sm:$0xff]  }
  0x6e   :  { %1368 = vmatpush2.bf16.msra.mxu0 %v2742_v53  ;;  %v2809_v53 = vld [vmem:[#allocation5 + $0x48] ss:$16 sps:$4 sm:$0xff]  }
  0x6f   :  { %1409 = vmatpush2.bf16.msra.mxu1 %v2743_v56  ;;  %1369 = vmatprep.subr.bf16.mxu0 %v2744_v57  ;;  %v2820_v56 = vld [vmem:[#allocation5 + $0x5e4] ss:$16 sps:$4 sm:$0xff]   ;;  %v2815_v57 = vld [vmem:[#allocation5 + $0x28] ss:$16 sps:$4 sm:$0xff]  }
  0x70   :  { %1410 = vmatprep.subr.bf16.mxu1 %v2746_v58  ;;  %v2818_v58 = vld [vmem:[#allocation5 + $0x5e0] ss:$16 sps:$4 sm:$0xff]  }
  0x72   :  { %1370 = vmatpush2.bf16.msra.mxu0 %v2748_v61  ;;  %v2821_v61 = vld [vmem:[#allocation5 + $0x8] ss:$16 sps:$4 sm:$0xff]  }
  0x73   :  { %1411 = vmatpush2.bf16.msra.mxu1 %v2749_v0  ;;  %1371 = vmatprep.subr.bf16.mxu0 %v2750_v1  ;;  %v2832_v0 = vld [vmem:[#allocation5 + $0x5a4] ss:$16 sps:$4 sm:$0xff]   ;;  %v2827_v1 = vld [vmem:[#allocation5 + $0x1e8] ss:$16 sps:$4 sm:$0xff]  }
  0x74   :  { %1412 = vmatprep.subr.bf16.mxu1 %v2752_v2  ;;  %v2830_v2 = vld [vmem:[#allocation5 + $0x5a0] ss:$16 sps:$4 sm:$0xff]  }
  0x76   :  { %1372 = vmatpush2.bf16.msra.mxu0 %v2754_v4  ;;  %v2835_v4 = vld [vmem:[#allocation5 + $0x1cc] ss:$16 sps:$4 sm:$0xff]  }
  0x77   :  { %1413 = vmatpush2.bf16.msra.mxu1 %v2755_v5  ;;  %1373 = vmatprep.subr.bf16.mxu0 %v2756_v6  ;;  %v2838_v5 = vld [vmem:[#allocation5 + $0x584] ss:$16 sps:$4 sm:$0xff]   ;;  %v2833_v6 = vld [vmem:[#allocation5 + $0x1c8] ss:$16 sps:$4 sm:$0xff]  }
  0x78   :  { %1414 = vmatprep.subr.bf16.mxu1 %v2758_v7  ;;  %v2836_v7 = vld [vmem:[#allocation5 + $0x580] ss:$16 sps:$4 sm:$0xff]  }
  0x7a   :  { %1374 = vmatpush2.bf16.msra.mxu0 %v2760_v8  ;;  %v2841_v8 = vld [vmem:[#allocation5 + $0x1ac] ss:$16 sps:$4 sm:$0xff]  }
  0x7b   :  { %1415 = vmatpush2.bf16.msra.mxu1 %v2761_v9  ;;  %1375 = vmatprep.subr.bf16.mxu0 %v2762_v10  ;;  %v2844_v9 = vld [vmem:[#allocation5 + $0x564] ss:$16 sps:$4 sm:$0xff]   ;;  %v2839_v10 = vld [vmem:[#allocation5 + $0x1a8] ss:$16 sps:$4 sm:$0xff]  }
  0x7c   :  { %1416 = vmatprep.subr.bf16.mxu1 %v2764_v11  ;;  %v2842_v11 = vld [vmem:[#allocation5 + $0x560] ss:$16 sps:$4 sm:$0xff]  }
  0x7e   :  { %1376 = vmatpush2.bf16.msra.mxu0 %v2766_v14  ;;  %v2850_v14 = vld [vmem:[#allocation5 + $0x544] ss:$16 sps:$4 sm:$0xff]  }
  0x7f   :  { %1417 = vmatpush2.bf16.msra.mxu1 %v2767_v15  ;;  %1427 = vmatprep.subr.bf16.mxu0 %v2771_v16  ;;  %v2845_v15 = vld [vmem:[#allocation5 + $0x188] ss:$16 sps:$4 sm:$0xff]   ;;  %v2848_v16 = vld [vmem:[#allocation5 + $0x540] ss:$16 sps:$4 sm:$0xff]  }
  0x80   :  { %1482 = vmatprep.subr.bf16.mxu1 %v2774_v17  ;;  %v2853_v17 = vld [vmem:[#allocation5 + $0x16c] ss:$16 sps:$4 sm:$0xff]  }
  0x81   :  { %1378 = vmatmul.mubr.bf16.vlgmr.msra.gmra.mxu0 %v3295_v19 }
  0x82   :  { %1419 = vmatmul.mubr.bf16.vlgmr.msra.gmra.mxu1 %v3297_v20  ;;  %1428 = vmatpush1.bf16.msra.mxu0 %v2769_v22  ;;  %v2854_v22 = vld [vmem:[#allocation5 + $0x520] ss:$16 sps:$4 sm:$0xff]  }
  0x83   :  { %1483 = vmatpush1.bf16.msra.mxu1 %v2772_v23  ;;  %1429 = vmatprep.subr.bf16.mxu0 %v2777_v24  ;;  %v2859_v23 = vld [vmem:[#allocation5 + $0x14c] ss:$16 sps:$4 sm:$0xff]   ;;  %v2862_v24 = vld [vmem:[#allocation5 + $0x504] ss:$16 sps:$4 sm:$0xff]  }
  0x84   :  { %1500 = vmatprep.mubr.bf16.mxu1 %v3220_v29  ;;  %1509 = vmatprep.subr.bf16.mxu1 %v2780_v25  ;;  %v2857_v25 = vld [vmem:[#allocation5 + $0x148] ss:$16 sps:$4 sm:$0xff]  }
  0x85   :  { %1459 = vmatprep.mubr.bf16.mxu0 %v3299_v26 }
  0x86   :  { %1430 = vmatpush1.bf16.msra.mxu0 %v2775_v28  ;;  %v2865_v28 = vld [vmem:[#allocation5 + $0x12c] ss:$16 sps:$4 sm:$0xff]  }
  0x87   :  { %1431 = vmatprep.subr.bf16.mxu0 %v2783_v30  ;;  %v2868_v30 = vld [vmem:[#allocation5 + $0x2ec] ss:$16 sps:$4 sm:$0xff]  }
  0x8a   :  { %2553 = vmatmul.mubr.msk.bf16.vlgmr.msra.gmra.mxu1 %vm1341_vm0, %v3306_v31  ;;  %1432 = vmatpush1.bf16.msra.mxu0 %v2781_v33  ;;  %v2863_v33 = vld [vmem:[#allocation5 + $0x128] ss:$16 sps:$4 sm:$0xff]  }
  0x8b   :  { %1510 = vmatpush1.bf16.msra.mxu1 %v2778_v32  ;;  %1433 = vmatprep.subr.bf16.mxu0 %v2790_v35  ;;  %v3313_v32 = vpack.c.bf16 %v3291_v13, %v3291_v13  ;;  %v2871_v35 = vld [vmem:[#allocation5 + $0x10c] ss:$16 sps:$4 sm:$0xff]   ;;  %v2875_v13 = vld [vmem:[#allocation5 + $0x4e8] ss:$16 sps:$4 sm:$0xff]  }
  0x8c   :  { %1511 = vmatprep.subr.bf16.mxu1 %v2787_v34  ;;  %1541 = vmatprep.mubr.bf16.mxu1 %v3284_v62  ;;  %v2824_v62 = vld [vmem:[#allocation5 + $0x5c0] ss:$16 sps:$4 sm:$0xff]   ;;  %v2866_v34 = vld [vmem:[#allocation5 + $0x2e8] ss:$16 sps:$4 sm:$0xff]  }
  0x8e   :  { %1434 = vmatpush1.bf16.msra.mxu0 %v2788_v37  ;;  %v2869_v37 = vld [vmem:[#allocation5 + $0x108] ss:$16 sps:$4 sm:$0xff]  }
  0x8f   :  { %1512 = vmatpush1.bf16.msra.mxu1 %v2785_v36  ;;  %1435 = vmatprep.subr.bf16.mxu0 %v2796_v39  ;;  %v2874_v36 = vld [vmem:[#allocation5 + $0x2cc] ss:$16 sps:$4 sm:$0xff]  }
  0x90   :  { %1513 = vmatprep.subr.bf16.mxu1 %v2793_v38  ;;  %v2872_v38 = vld [vmem:[#allocation5 + $0x2c8] ss:$16 sps:$4 sm:$0xff]   ;;  %v2877_v39 = vld [vmem:[#allocation5 + $0x4ec] ss:$16 sps:$4 sm:$0xff]  }
  0x92   :  { %1436 = vmatpush1.bf16.msra.mxu0 %v2794_v41  ;;  %v2878_v41 = vld [vmem:[#allocation5 + $0x2a8] ss:$16 sps:$4 sm:$0xff]  }
  0x93   :  { %1514 = vmatpush1.bf16.msra.mxu1 %v2791_v40  ;;  %1437 = vmatprep.subr.bf16.mxu0 %v2802_v44  ;;  %v2880_v40 = vld [vmem:[#allocation5 + $0x2ac] ss:$16 sps:$4 sm:$0xff]  }
  0x94   :  { %1515 = vmatprep.subr.bf16.mxu1 %v2799_v42  ;;  %v2883_v42 = vld [vmem:[#allocation5 + $0x4cc] ss:$16 sps:$4 sm:$0xff]  }
  0x95   :  { %v2886_v44 = vld [vmem:[#allocation5 + $0x28c] ss:$16 sps:$4 sm:$0xff]  }
  0x96   :  { %1438 = vmatpush1.bf16.msra.mxu0 %v2800_v46  ;;  %v2884_v46 = vld [vmem:[#allocation5 + $0x288] ss:$16 sps:$4 sm:$0xff]  }
  0x97   :  { %1516 = vmatpush1.bf16.msra.mxu1 %v2797_v45  ;;  %1439 = vmatprep.subr.bf16.mxu0 %v2808_v48  ;;  %v2881_v45 = vld [vmem:[#allocation5 + $0x4c8] ss:$16 sps:$4 sm:$0xff]   ;;  %v2892_v48 = vld [vmem:[#allocation5 + $0x26c] ss:$16 sps:$4 sm:$0xff]  }
  0x98   :  { %1517 = vmatprep.subr.bf16.mxu1 %v2805_v47  ;;  %v2889_v47 = vld [vmem:[#allocation5 + $0x4ac] ss:$16 sps:$4 sm:$0xff]  }
  0x9a   :  { %1440 = vmatpush1.bf16.msra.mxu0 %v2806_v50  ;;  %v2895_v50 = vld [vmem:[#allocation5 + $0x48c] ss:$16 sps:$4 sm:$0xff]  }
  0x9b   :  { %1518 = vmatpush1.bf16.msra.mxu1 %v2803_v49  ;;  %1441 = vmatprep.subr.bf16.mxu0 %v2814_v52  ;;  %v2887_v49 = vld [vmem:[#allocation5 + $0x4a8] ss:$16 sps:$4 sm:$0xff]  }
  0x9c   :  { %1519 = vmatprep.subr.bf16.mxu1 %v2811_v51  ;;  %v2898_v51 = vld [vmem:[#allocation5 + $0x24c] ss:$16 sps:$4 sm:$0xff]   ;;  %v2893_v52 = vld [vmem:[#allocation5 + $0x488] ss:$16 sps:$4 sm:$0xff]  }
  0x9e   :  { %1442 = vmatpush1.bf16.msra.mxu0 %v2812_v54  ;;  %v2904_v54 = vld [vmem:[#allocation5 + $0x22c] ss:$16 sps:$4 sm:$0xff]  }
  0x9f   :  { %1520 = vmatpush1.bf16.msra.mxu1 %v2809_v53  ;;  %1443 = vmatprep.subr.bf16.mxu0 %v2820_v56  ;;  %v2901_v53 = vld [vmem:[#allocation5 + $0x46c] ss:$16 sps:$4 sm:$0xff]   ;;  %v2902_v56 = vld [vmem:[#allocation5 + $0x228] ss:$16 sps:$4 sm:$0xff]  }
  0xa0   :  { %1521 = vmatprep.subr.bf16.mxu1 %v2817_v55  ;;  %v2899_v55 = vld [vmem:[#allocation5 + $0x468] ss:$16 sps:$4 sm:$0xff]  }
  0xa2   :  { %1444 = vmatpush2.bf16.msra.mxu0 %v2818_v58  ;;  %v2905_v58 = vld [vmem:[#allocation5 + $0x448] ss:$16 sps:$4 sm:$0xff]  }
  0xa3   :  { %1522 = vmatpush1.bf16.msra.mxu1 %v2815_v57  ;;  %1445 = vmatprep.subr.bf16.mxu0 %v2826_v60  ;;  %v2910_v57 = vld [vmem:[#allocation5 + $0x20c] ss:$16 sps:$4 sm:$0xff]  }
  0xa4   :  { %1523 = vmatprep.subr.bf16.mxu1 %v2823_v59  ;;  %v2908_v59 = vld [vmem:[#allocation5 + $0x208] ss:$16 sps:$4 sm:$0xff]   ;;  %v2913_v60 = vld [vmem:[#allocation5 + $0x42c] ss:$16 sps:$4 sm:$0xff]  }
  0xa6   :  { %1446 = vmatpush2.bf16.msra.mxu0 %v2824_v62  ;;  %v2911_v62 = vld [vmem:[#allocation5 + $0x428] ss:$16 sps:$4 sm:$0xff]  }
  0xa7   :  { %1524 = vmatpush1.bf16.msra.mxu1 %v2821_v61  ;;  %1447 = vmatprep.subr.bf16.mxu0 %v2832_v0  ;;  %v2916_v61 = vld [vmem:[#allocation5 + $0x3ec] ss:$16 sps:$4 sm:$0xff]  }
  0xa8   :  { %1525 = vmatprep.subr.bf16.mxu1 %v2829_v63  ;;  %v2914_v63 = vld [vmem:[#allocation5 + $0x3e8] ss:$16 sps:$4 sm:$0xff]   ;;  %v2919_v0 = vld [vmem:[#allocation5 + $0x40c] ss:$16 sps:$4 sm:$0xff]  }
  0xaa   :  { %1448 = vmatpush2.bf16.msra.mxu0 %v2830_v2  ;;  %v2917_v2 = vld [vmem:[#allocation5 + $0x408] ss:$16 sps:$4 sm:$0xff]  }
  0xab   :  { %1526 = vmatpush2.bf16.msra.mxu1 %v2827_v1  ;;  %1449 = vmatprep.subr.bf16.mxu0 %v2838_v5  ;;  %v2922_v1 = vld [vmem:[#allocation5 + $0x3cc] ss:$16 sps:$4 sm:$0xff]  }
  0xac   :  { %1527 = vmatprep.subr.bf16.mxu1 %v2835_v4  ;;  %v2920_v4 = vld [vmem:[#allocation5 + $0x3c8] ss:$16 sps:$4 sm:$0xff]   ;;  %v2925_v5 = vld [vmem:[#allocation5 + $0x5ec] ss:$16 sps:$4 sm:$0xff]  }
  0xae   :  { %1450 = vmatpush2.bf16.msra.mxu0 %v2836_v7  ;;  %v2923_v7 = vld [vmem:[#allocation5 + $0x5e8] ss:$16 sps:$4 sm:$0xff]  }
  0xaf   :  { %1528 = vmatpush2.bf16.msra.mxu1 %v2833_v6  ;;  %1451 = vmatprep.subr.bf16.mxu0 %v2844_v9  ;;  %v2928_v6 = vld [vmem:[#allocation5 + $0x3ac] ss:$16 sps:$4 sm:$0xff]  }
  0xb0   :  { %1529 = vmatprep.subr.bf16.mxu1 %v2841_v8  ;;  %v2926_v8 = vld [vmem:[#allocation5 + $0x3a8] ss:$16 sps:$4 sm:$0xff]   ;;  %v2931_v9 = vld [vmem:[#allocation5 + $0x5cc] ss:$16 sps:$4 sm:$0xff]  }
  0xb2   :  { %1452 = vmatpush2.bf16.msra.mxu0 %v2842_v11  ;;  %v2929_v11 = vld [vmem:[#allocation5 + $0x5c8] ss:$16 sps:$4 sm:$0xff]  }
  0xb3   :  { %1530 = vmatpush2.bf16.msra.mxu1 %v2839_v10  ;;  %1453 = vmatprep.subr.bf16.mxu0 %v2850_v14  ;;  %v2934_v10 = vld [vmem:[#allocation5 + $0x38c] ss:$16 sps:$4 sm:$0xff]  }
  0xb4   :  { %1531 = vmatprep.subr.bf16.mxu1 %v2847_v12  ;;  %v2932_v12 = vld [vmem:[#allocation5 + $0x388] ss:$16 sps:$4 sm:$0xff]   ;;  %v2937_v14 = vld [vmem:[#allocation5 + $0x5ac] ss:$16 sps:$4 sm:$0xff]  }
  0xb6   :  { %1454 = vmatpush2.bf16.msra.mxu0 %v2848_v16  ;;  %v2935_v16 = vld [vmem:[#allocation5 + $0x5a8] ss:$16 sps:$4 sm:$0xff]  }
  0xb7   :  { %1532 = vmatpush2.bf16.msra.mxu1 %v2845_v15  ;;  %1455 = vmatprep.subr.bf16.mxu0 %v2856_v18  ;;  %v2940_v15 = vld [vmem:[#allocation5 + $0x36c] ss:$16 sps:$4 sm:$0xff]  }
  0xb8   :  { %1533 = vmatprep.subr.bf16.mxu1 %v2853_v17  ;;  %v2938_v17 = vld [vmem:[#allocation5 + $0x368] ss:$16 sps:$4 sm:$0xff]   ;;  %v2943_v18 = vld [vmem:[#allocation5 + $0x58c] ss:$16 sps:$4 sm:$0xff]  }
  0xba   :  { %1456 = vmatpush2.bf16.msra.mxu0 %v2854_v22  ;;  %v2941_v22 = vld [vmem:[#allocation5 + $0x588] ss:$16 sps:$4 sm:$0xff]  }
  0xbb   :  { %1534 = vmatpush2.bf16.msra.mxu1 %v2851_v21  ;;  %1457 = vmatprep.subr.bf16.mxu0 %v2862_v24  ;;  %v2946_v21 = vld [vmem:[#allocation5 + $0x34c] ss:$16 sps:$4 sm:$0xff]  }
  0xbc   :  { %1535 = vmatprep.subr.bf16.mxu1 %v2859_v23  ;;  %v2944_v23 = vld [vmem:[#allocation5 + $0x348] ss:$16 sps:$4 sm:$0xff]   ;;  %v2949_v24 = vld [vmem:[#allocation5 + $0x56c] ss:$16 sps:$4 sm:$0xff]  }
  0xbe   :  { %1458 = vmatpush2.bf16.msra.mxu0 %v2860_v27  ;;  %v2947_v27 = vld [vmem:[#allocation5 + $0x568] ss:$16 sps:$4 sm:$0xff]  }
  0xbf   :  { %1536 = vmatpush2.bf16.msra.mxu1 %v2857_v25  ;;  %1550 = vmatprep.subr.bf16.mxu0 %v2868_v30  ;;  %v2952_v25 = vld [vmem:[#allocation5 + $0x32c] ss:$16 sps:$4 sm:$0xff]  }
  0xc0   :  { %1537 = vmatprep.subr.bf16.mxu1 %v2865_v28  ;;  %v2950_v28 = vld [vmem:[#allocation5 + $0x328] ss:$16 sps:$4 sm:$0xff]   ;;  %v2955_v30 = vld [vmem:[#allocation5 + $0x54c] ss:$16 sps:$4 sm:$0xff]  }
  0xc1   :  { %1460 = vmatmul.mubr.bf16.vlgmr.msra.gmra.mxu0 %v3313_v32 }
  0xc2   :  { %1551 = vmatpush1.bf16.msra.mxu0 %v2866_v34  ;;  %1582 = vmatprep.mubr.bf16.mxu0 %v3286_v3  ;;  %v2890_v3 = vld [vmem:[#allocation5 + $0x268] ss:$16 sps:$4 sm:$0xff]  }
  0xc3   :  { %1538 = vmatpush2.bf16.msra.mxu1 %v2863_v33  ;;  %1552 = vmatprep.subr.bf16.mxu0 %v2874_v36  ;;  %v2958_v33 = vld [vmem:[#allocation5 + $0x30c] ss:$16 sps:$4 sm:$0xff]   ;;  %v2953_v34 = vld [vmem:[#allocation5 + $0x548] ss:$16 sps:$4 sm:$0xff]  }
  0xc4   :  { %1539 = vmatprep.subr.bf16.mxu1 %v2871_v35  ;;  %v2956_v35 = vld [vmem:[#allocation5 + $0x308] ss:$16 sps:$4 sm:$0xff]   ;;  %v2961_v36 = vld [vmem:[#allocation5 + $0x52c] ss:$16 sps:$4 sm:$0xff]  }
  0xc6   :  { %1553 = vmatpush1.bf16.msra.mxu0 %v2872_v38  ;;  %v2959_v38 = vld [vmem:[#allocation5 + $0x528] ss:$16 sps:$4 sm:$0xff]  }
  0xc7   :  { %1540 = vmatpush2.bf16.msra.mxu1 %v2869_v37  ;;  %1554 = vmatprep.subr.bf16.mxu0 %v2880_v40  ;;  %v2970_v37 = vld [vmem:[#allocation8 + $0x74] ss:$8 sps:$4 sm:$0xff]   ;;  %v2964_v40 = vld [vmem:[#allocation5 + $0x50c] ss:$16 sps:$4 sm:$0xff]  }
  0xc8   :  { %1591 = vmatprep.subr.bf16.mxu1 %v2877_v39  ;;  %v2968_v39 = vld [vmem:[#allocation8 + $0x70] ss:$8 sps:$4 sm:$0xff]  }
  0xca   :  { %1542 = vmatmul.mubr.bf16.vlgmr.msra.gmra.mxu1 %v3295_v19  ;;  %1555 = vmatpush1.bf16.msra.mxu0 %v2878_v41  ;;  %v2896_v19 = vld [vmem:[#allocation5 + $0x248] ss:$16 sps:$4 sm:$0xff]  }
  0xcb   :  { %1592 = vmatpush1.bf16.msra.mxu1 %v2875_v13  ;;  %1556 = vmatprep.subr.bf16.mxu0 %v2886_v44  ;;  %v2973_v13 = vld [vmem:[#allocation8 + $0x64] ss:$8 sps:$4 sm:$0xff]   ;;  %v2967_v44 = vld [vmem:[#allocation5 + $0x60c] ss:$16 sps:$4 sm:$0xff]  }
  0xcc   :  { %1593 = vmatprep.subr.bf16.mxu1 %v2883_v42  ;;  %1623 = vmatprep.mubr.bf16.mxu1 %v3299_v26  ;;  %v2907_v26 = vld [vmem:[#allocation5 + $0x44c] ss:$16 sps:$4 sm:$0xff]   ;;  %v2962_v41 = vld [vmem:[#allocation5 + $0x508] ss:$16 sps:$4 sm:$0xff]  }
  0xcd   :  { %v2971_v42 = vld [vmem:[#allocation8 + $0x60] ss:$8 sps:$4 sm:$0xff]  }
  0xce   :  { %1557 = vmatpush1.bf16.msra.mxu0 %v2884_v46  ;;  %v2965_v46 = vld [vmem:[#allocation5 + $0x608] ss:$16 sps:$4 sm:$0xff]  }
  0xcf   :  { %1594 = vmatpush1.bf16.msra.mxu1 %v2881_v45  ;;  %1558 = vmatprep.subr.bf16.mxu0 %v2892_v48  ;;  %v2976_v45 = vld [vmem:[#allocation8 + $0x54] ss:$8 sps:$4 sm:$0xff]   ;;  %v2979_v48 = vld [vmem:[#allocation8 + $0x44] ss:$8 sps:$4 sm:$0xff]  }
  0xd0   :  { %1595 = vmatprep.subr.bf16.mxu1 %v2889_v47  ;;  %v2974_v47 = vld [vmem:[#allocation8 + $0x50] ss:$8 sps:$4 sm:$0xff]  }
  0xd2   :  { %1559 = vmatpush1.bf16.msra.mxu0 %v2890_v3  ;;  %v2980_v3 = vld [vmem:[#allocation8 + $0x30] ss:$8 sps:$4 sm:$0xff]  }
  0xd3   :  { %1596 = vmatpush1.bf16.msra.mxu1 %v2887_v49  ;;  %1560 = vmatprep.subr.bf16.mxu0 %v2898_v51  ;;  %v2982_v49 = vld [vmem:[#allocation8 + $0x34] ss:$8 sps:$4 sm:$0xff]  }
  0xd4   :  { %1597 = vmatprep.subr.bf16.mxu1 %v2895_v50  ;;  %v3016_v50 = vld [vmem:[#allocation8 + $0x170] ss:$8 sps:$4 sm:$0xff]   ;;  %v3018_v51 = vld [vmem:[#allocation8 + $0x174] ss:$8 sps:$4 sm:$0xff]  }
  0xd6   :  { %1561 = vmatpush1.bf16.msra.mxu0 %v2896_v19  ;;  %v3021_v19 = vld [vmem:[#allocation8 + $0x164] ss:$8 sps:$4 sm:$0xff]  }
  0xd7   :  { %1598 = vmatpush1.bf16.msra.mxu1 %v2893_v52  ;;  %1562 = vmatprep.subr.bf16.mxu0 %v2904_v54  ;;  %v2985_v52 = vld [vmem:[#allocation8 + $0x24] ss:$8 sps:$4 sm:$0xff]   ;;  %v2988_v54 = vld [vmem:[#allocation8 + $0x14] ss:$8 sps:$4 sm:$0xff]  }
  0xd8   :  { %1599 = vmatprep.subr.bf16.mxu1 %v2901_v53  ;;  %v2983_v53 = vld [vmem:[#allocation8 + $0x20] ss:$8 sps:$4 sm:$0xff]  }
  0xda   :  { %1563 = vmatpush1.bf16.msra.mxu0 %v2902_v56  ;;  %v2986_v56 = vld [vmem:[#allocation8 + $0x10] ss:$8 sps:$4 sm:$0xff]  }
  0xdb   :  { %1600 = vmatpush1.bf16.msra.mxu1 %v2899_v55  ;;  %1564 = vmatprep.subr.bf16.mxu0 %v2910_v57  ;;  %v3022_v55 = vld [vmem:[#allocation8 + $0x150] ss:$8 sps:$4 sm:$0xff]   ;;  %v2991_v57 = vld [vmem:[#allocation8 + $0x4] ss:$8 sps:$4 sm:$0xff]  }
  0xdc   :  { %1601 = vmatprep.subr.bf16.mxu1 %v2907_v26  ;;  %v3027_v26 = vld [vmem:[#allocation8 + $0x144] ss:$8 sps:$4 sm:$0xff]  }
  0xde   :  { %1565 = vmatpush1.bf16.msra.mxu0 %v2908_v59  ;;  %v3030_v59 = vld [vmem:[#allocation8 + $0x134] ss:$8 sps:$4 sm:$0xff]  }
  0xdf   :  { %1602 = vmatpush1.bf16.msra.mxu1 %v2905_v58  ;;  %1566 = vmatprep.subr.bf16.mxu0 %v2916_v61  ;;  %v3025_v58 = vld [vmem:[#allocation8 + $0x140] ss:$8 sps:$4 sm:$0xff]   ;;  %v3028_v61 = vld [vmem:[#allocation8 + $0x130] ss:$8 sps:$4 sm:$0xff]  }
  0xe0   :  { %1603 = vmatprep.subr.bf16.mxu1 %v2913_v60  ;;  %v2994_v60 = vld [vmem:[#allocation8 + $0xf4] ss:$8 sps:$4 sm:$0xff]  }
  0xe2   :  { %1567 = vmatpush2.bf16.msra.mxu0 %v2914_v63  ;;  %v3033_v63 = vld [vmem:[#allocation8 + $0x124] ss:$8 sps:$4 sm:$0xff]  }
  0xe3   :  { %1604 = vmatpush1.bf16.msra.mxu1 %v2911_v62  ;;  %1568 = vmatprep.subr.bf16.mxu0 %v2922_v1  ;;  %v2992_v62 = vld [vmem:[#allocation8 + $0xf0] ss:$8 sps:$4 sm:$0xff]   ;;  %v3031_v1 = vld [vmem:[#allocation8 + $0x120] ss:$8 sps:$4 sm:$0xff]  }
  0xe4   :  { %1605 = vmatprep.subr.bf16.mxu1 %v2919_v0  ;;  %v2997_v0 = vld [vmem:[#allocation8 + $0xe4] ss:$8 sps:$4 sm:$0xff]  }
  0xe6   :  { %1569 = vmatpush2.bf16.msra.mxu0 %v2920_v4  ;;  %v3036_v4 = vld [vmem:[#allocation8 + $0x114] ss:$8 sps:$4 sm:$0xff]  }
  0xe7   :  { %1606 = vmatpush1.bf16.msra.mxu1 %v2917_v2  ;;  %1570 = vmatprep.subr.bf16.mxu0 %v2928_v6  ;;  %v2995_v2 = vld [vmem:[#allocation8 + $0xe0] ss:$8 sps:$4 sm:$0xff]   ;;  %v3034_v6 = vld [vmem:[#allocation8 + $0x110] ss:$8 sps:$4 sm:$0xff]  }
  0xe8   :  { %1607 = vmatprep.subr.bf16.mxu1 %v2925_v5  ;;  %v3000_v5 = vld [vmem:[#allocation8 + $0xd4] ss:$8 sps:$4 sm:$0xff]  }
  0xea   :  { %1571 = vmatpush2.bf16.msra.mxu0 %v2926_v8  ;;  %v3039_v8 = vld [vmem:[#allocation8 + $0x104] ss:$8 sps:$4 sm:$0xff]  }
  0xeb   :  { %1608 = vmatpush2.bf16.msra.mxu1 %v2923_v7  ;;  %1572 = vmatprep.subr.bf16.mxu0 %v2934_v10  ;;  %v2998_v7 = vld [vmem:[#allocation8 + $0xd0] ss:$8 sps:$4 sm:$0xff]   ;;  %v3037_v10 = vld [vmem:[#allocation8 + $0x100] ss:$8 sps:$4 sm:$0xff]  }
  0xec   :  { %1609 = vmatprep.subr.bf16.mxu1 %v2931_v9  ;;  %v3003_v9 = vld [vmem:[#allocation8 + $0xc4] ss:$8 sps:$4 sm:$0xff]  }
  0xee   :  { %1573 = vmatpush2.bf16.msra.mxu0 %v2932_v12  ;;  %v3042_v12 = vld [vmem:[#allocation8 + $0x1f4] ss:$8 sps:$4 sm:$0xff]  }
  0xef   :  { %1610 = vmatpush2.bf16.msra.mxu1 %v2929_v11  ;;  %1574 = vmatprep.subr.bf16.mxu0 %v2940_v15  ;;  %v3001_v11 = vld [vmem:[#allocation8 + $0xc0] ss:$8 sps:$4 sm:$0xff]   ;;  %v3040_v15 = vld [vmem:[#allocation8 + $0x1f0] ss:$8 sps:$4 sm:$0xff]  }
  0xf0   :  { %1611 = vmatprep.subr.bf16.mxu1 %v2937_v14  ;;  %v3006_v14 = vld [vmem:[#allocation8 + $0xb4] ss:$8 sps:$4 sm:$0xff]  }
  0xf2   :  { %1575 = vmatpush2.bf16.msra.mxu0 %v2938_v17  ;;  %v3045_v17 = vld [vmem:[#allocation8 + $0x1e4] ss:$8 sps:$4 sm:$0xff]  }
  0xf3   :  { %1612 = vmatpush2.bf16.msra.mxu1 %v2935_v16  ;;  %1576 = vmatprep.subr.bf16.mxu0 %v2946_v21  ;;  %v3004_v16 = vld [vmem:[#allocation8 + $0xb0] ss:$8 sps:$4 sm:$0xff]   ;;  %v3043_v21 = vld [vmem:[#allocation8 + $0x1e0] ss:$8 sps:$4 sm:$0xff]  }
  0xf4   :  { %1613 = vmatprep.subr.bf16.mxu1 %v2943_v18  ;;  %v3009_v18 = vld [vmem:[#allocation8 + $0xa4] ss:$8 sps:$4 sm:$0xff]  }
  0xf6   :  { %1577 = vmatpush2.bf16.msra.mxu0 %v2944_v23  ;;  %v3012_v23 = vld [vmem:[#allocation8 + $0x94] ss:$8 sps:$4 sm:$0xff]  }
  0xf7   :  { %1614 = vmatpush2.bf16.msra.mxu1 %v2941_v22  ;;  %1578 = vmatprep.subr.bf16.mxu0 %v2952_v25  ;;  %v3007_v22 = vld [vmem:[#allocation8 + $0xa0] ss:$8 sps:$4 sm:$0xff]   ;;  %v3015_v25 = vld [vmem:[#allocation8 + $0x84] ss:$8 sps:$4 sm:$0xff]  }
  0xf8   :  { %1615 = vmatprep.subr.bf16.mxu1 %v2949_v24  ;;  %v3010_v24 = vld [vmem:[#allocation8 + $0x90] ss:$8 sps:$4 sm:$0xff]  }
  0xfa   :  { %1579 = vmatpush2.bf16.msra.mxu0 %v2950_v28 }
  0xfb   :  { %1616 = vmatpush2.bf16.msra.mxu1 %v2947_v27  ;;  %1580 = vmatprep.subr.bf16.mxu0 %v2958_v33  ;;  %v3013_v27 = vld [vmem:[#allocation8 + $0x80] ss:$8 sps:$4 sm:$0xff]   ;;  %v3048_v33 = vld [vmem:[#allocation8 + $0x1d4] ss:$8 sps:$4 sm:$0xff]  }
  0xfc   :  { %1617 = vmatprep.subr.bf16.mxu1 %v2955_v30 }
  0xfe   :  { %1581 = vmatpush2.bf16.msra.mxu0 %v2956_v35 }
  0xff   :  { %1618 = vmatpush2.bf16.msra.mxu1 %v2953_v34  ;;  %2077 = vmatprep.subr.bf16.mxu0 %v2970_v37  ;;  %v3046_v34 = vld [vmem:[#allocation8 + $0x1d0] ss:$8 sps:$4 sm:$0xff]   ;;  %v3049_v37 = vld [vmem:[#allocation8 + $0x1c0] ss:$8 sps:$4 sm:$0xff]  }
 0x100   :  { %1619 = vmatprep.subr.bf16.mxu1 %v2961_v36 }
 0x101   :  { %1583 = vmatmul.mubr.bf16.vlgmr.msra.gmra.mxu0 %v3297_v20  ;;  %v2977_v20 = vld [vmem:[#allocation8 + $0x40] ss:$8 sps:$4 sm:$0xff]  }
 0x102   :  { %2078 = vmatpush1.bf16.msra.mxu0 %v2968_v39 }
 0x103   :  { %1620 = vmatpush2.bf16.msra.mxu1 %v2959_v38  ;;  %2079 = vmatprep.subr.bf16.mxu0 %v2973_v13  ;;  %v3051_v38 = vld [vmem:[#allocation8 + $0x1c4] ss:$8 sps:$4 sm:$0xff]  }
 0x104   :  { %1621 = vmatprep.subr.bf16.mxu1 %v2964_v40 }
 0x106   :  { %2080 = vmatpush1.bf16.msra.mxu0 %v2971_v42 }
 0x107   :  { %1622 = vmatpush2.bf16.msra.mxu1 %v2962_v41  ;;  %2081 = vmatprep.subr.bf16.mxu0 %v2976_v45  ;;  %v3052_v45 = vld [vmem:[#allocation8 + $0x1b0] ss:$8 sps:$4 sm:$0xff]  }
 0x108   :  { %1646 = vmatprep.subr.bf16.mxu1 %v2967_v44  ;;  %v3054_v44 = vld [vmem:[#allocation8 + $0x1b4] ss:$8 sps:$4 sm:$0xff]  }
 0x10a   :  { %1624 = vmatmul.mubr.bf16.vlgmr.msra.gmra.mxu1 %v3313_v32  ;;  %2082 = vmatpush1.bf16.msra.mxu0 %v2974_v47  ;;  %v3019_v32 = vld [vmem:[#allocation8 + $0x160] ss:$8 sps:$4 sm:$0xff]  }
 0x10b   :  { %1647 = vmatpush1.bf16.msra.mxu1 %v2965_v46  ;;  %1664 = vmatprep.mubr.bf16.mxu1 %v3220_v29  ;;  %v3024_v29 = vld [vmem:[#allocation8 + $0x154] ss:$8 sps:$4 sm:$0xff]  }
 0x10c   :  { %2083 = vmatprep.subr.bf16.mxu0 %v2979_v48  ;;  %2118 = vmatprep.subr.bf16.mxu1 %v3018_v51  ;;  %v3057_v48 = vld [vmem:[#allocation8 + $0x1a4] ss:$8 sps:$4 sm:$0xff]  }
 0x10d   :  { %v3063_v51 = vld [vmem:[#allocation8 + $0x184] ss:$8 sps:$4 sm:$0xff]  }
 0x10e   :  { %2084 = vmatpush1.bf16.msra.mxu0 %v2977_v20  ;;  %v3055_v20 = vld [vmem:[#allocation8 + $0x1a0] ss:$8 sps:$4 sm:$0xff]  }
 0x10f   :  { %2085 = vmatprep.subr.bf16.mxu0 %v2982_v49 }
 0x112   :  { %2554 = vmatmul.mubr.msk.bf16.vlgmr.msra.gmra.mxu1 %vm1341_vm0, %v3306_v31  ;;  %2086 = vmatpush1.bf16.msra.mxu0 %v2980_v3  ;;  %v2989_v31 = vld [vmem:[#allocation8] ss:$8 sps:$4 sm:$0xff]   ;;  %v3060_v3 = vld [vmem:[#allocation8 + $0x194] ss:$8 sps:$4 sm:$0xff]  }
 0x113   :  { %2119 = vmatpush1.bf16.msra.mxu1 %v3016_v50  ;;  %2087 = vmatprep.subr.bf16.mxu0 %v2985_v52  ;;  %v3058_v50 = vld [vmem:[#allocation8 + $0x190] ss:$8 sps:$4 sm:$0xff]   ;;  %v3061_v52 = vld [vmem:[#allocation8 + $0x180] ss:$8 sps:$4 sm:$0xff]  }
 0x114   :  { %2120 = vmatprep.subr.bf16.mxu1 %v3021_v19  ;;  %v343_v19 = vsub.s32 0, %v3277_v43 }
 0x116   :  { %2088 = vmatpush1.bf16.msra.mxu0 %v2983_v53  ;;  %v347_v53 = vsub.s32 1, %v3277_v43 }
 0x117   :  { %2121 = vmatpush1.bf16.msra.mxu1 %v3019_v32  ;;  %2089 = vmatprep.subr.bf16.mxu0 %v2988_v54  ;;  %v339_v32 = vld [vmem:[#allocation7] sm:$0xf] }
 0x118   :  { %2122 = vmatprep.subr.bf16.mxu1 %v3024_v29  ;;  %v344_v29 = vrot.slane %v339_v32, %v343_v19  ;;  %v348_v54 = vrot.slane %v339_v32, %v347_v53 }
 0x11a   :  { %2090 = vmatpush1.bf16.msra.mxu0 %v2986_v56 }
 0x11b   :  { %2123 = vmatpush1.bf16.msra.mxu1 %v3022_v55  ;;  %2091 = vmatprep.subr.bf16.mxu0 %v2991_v57 }
 0x11c   :  { %2124 = vmatprep.subr.bf16.mxu1 %v3027_v26 }
 0x11e   :  { %2092 = vmatpush1.bf16.msra.mxu0 %v2989_v31 }
 0x11f   :  { %2125 = vmatpush1.bf16.msra.mxu1 %v3025_v58  ;;  %2093 = vmatprep.subr.bf16.mxu0 %v2994_v60 }
 0x120   :  { %2126 = vmatprep.subr.bf16.mxu1 %v3030_v59 }
 0x122   :  { %2094 = vmatpush2.bf16.msra.mxu0 %v2992_v62 }
 0x123   :  { %2127 = vmatpush1.bf16.msra.mxu1 %v3028_v61  ;;  %2095 = vmatprep.subr.bf16.mxu0 %v2997_v0 }
 0x124   :  { %2128 = vmatprep.subr.bf16.mxu1 %v3033_v63 }
 0x126   :  { %2096 = vmatpush2.bf16.msra.mxu0 %v2995_v2 }
 0x127   :  { %2129 = vmatpush1.bf16.msra.mxu1 %v3031_v1  ;;  %2097 = vmatprep.subr.bf16.mxu0 %v3000_v5 }
 0x128   :  { %2130 = vmatprep.subr.bf16.mxu1 %v3036_v4 }
 0x12a   :  { %2098 = vmatpush2.bf16.msra.mxu0 %v2998_v7 }
 0x12b   :  { %2131 = vmatpush1.bf16.msra.mxu1 %v3034_v6  ;;  %2099 = vmatprep.subr.bf16.mxu0 %v3003_v9 }
 0x12c   :  { %2132 = vmatprep.subr.bf16.mxu1 %v3039_v8 }
 0x12e   :  { %2100 = vmatpush2.bf16.msra.mxu0 %v3001_v11 }
 0x12f   :  { %2133 = vmatpush1.bf16.msra.mxu1 %v3037_v10  ;;  %2101 = vmatprep.subr.bf16.mxu0 %v3006_v14 }
 0x130   :  { %2134 = vmatprep.subr.bf16.mxu1 %v3042_v12  ;;  %v351_v12 = vsub.s32 2, %v3277_v43 }
 0x132   :  { %2102 = vmatpush2.bf16.msra.mxu0 %v3004_v16 }
 0x133   :  { %2135 = vmatpush2.bf16.msra.mxu1 %v3040_v15  ;;  %2103 = vmatprep.subr.bf16.mxu0 %v3009_v18  ;;  %v355_v15 = vsub.s32 3, %v3277_v43  ;;  %v2619_v43 = vld [vmem:[%s3351_s6] ss:$0 sm:$0xff] }
 0x134   :  { %2136 = vmatprep.subr.bf16.mxu1 %v3045_v17  ;;  %v352_v17 = vrot.slane %v339_v32, %v351_v12 }
 0x136   :  { %2104 = vmatpush2.bf16.msra.mxu0 %v3007_v22 }
 0x137   :  { %2137 = vmatpush2.bf16.msra.mxu1 %v3043_v21  ;;  %2105 = vmatprep.subr.bf16.mxu0 %v3012_v23  ;;  %v356_v21 = vrot.slane %v339_v32, %v355_v15  ;;  %v3074_v32 = vld [vmem:[#allocation10 + $0x50] sm:$0xff]  }
 0x138   :  { %2138 = vmatprep.subr.bf16.mxu1 %v3048_v33 }
 0x13a   :  { %2106 = vmatpush2.bf16.msra.mxu0 %v3010_v24 }
 0x13b   :  { %2107 = vmatprep.subr.bf16.mxu0 %v3015_v25  ;;  %2139 = vmatpush2.bf16.msra.mxu1 %v3046_v34 }
 0x13c   :  { %2140 = vmatprep.subr.bf16.mxu1 %v3051_v38  ;;  %v3064_v38 = vld [vmem:[#allocation10 + $0x78] sm:$0xff]  }
 0x13e   :  { %2108 = vmatpush2.bf16.msra.mxu0 %v3013_v27 }
 0x13f   :  { %2141 = vmatpush2.bf16.msra.mxu1 %v3049_v37  ;;  %2636 = vmatprep.subr.bf16.mxu0 %v3064_v38 }
 0x140   :  { %2142 = vmatprep.subr.bf16.mxu1 %v3054_v44 }
 0x141   :  { %v1379_v28 = vpop.f32.mrf.mxu0 }
 0x142   :  { %v1420_v30 = vpop.f32.mrf.mxu1  ;;  %v1380_v55 = vadd.f32 %v1379_v28, %v344_v29  ;;  %v3075_v29 = vld [vmem:[#allocation10 + $0x10] sm:$0xff]  }
 0x143   :  { %v1381_v35 = vpop.f32.mrf.mxu0  ;;  %2143 = vmatpush2.bf16.msra.mxu1 %v3052_v45  ;;  %v3067_v45 = vld [vmem:[#allocation10 + $0x30] sm:$0xff]  }
 0x144   :  { %v1422_v36 = vpop.f32.mrf.mxu1  ;;  %2144 = vmatprep.subr.bf16.mxu1 %v3057_v48  ;;  %v1382_v56 = vadd.f32 %v1381_v35, %v348_v54  ;;  %v1421_v26 = vadd.f32 %v1420_v30, %v1380_v55  ;;  %v3076_v54 = vld [vmem:[#allocation10 + $0x48] sm:$0xff]  }
 0x145   :  { %v1383_v40 = vpop.f32.mrf.mxu0  ;;  %v3077_v55 = vld [vmem:[#allocation10 + $0x8] sm:$0xff]  }
 0x146   :  { %v1424_v39 = vpop.f32.mrf.mxu1  ;;  %v1423_v58 = vadd.f32 %v1422_v36, %v1382_v56  ;;  %v3066_v40 = vld [vmem:[#allocation10 + $0x70] sm:$0xff]   ;;  %v3078_v56 = vld [vmem:[#allocation10 + $0x40] sm:$0xff]  }
 0x147   :  { %v1384_v41 = vpop.f32.mrf.mxu0  ;;  %2145 = vmatpush2.bf16.msra.mxu1 %v3055_v20  ;;  %v3065_v39 = vld [vmem:[#allocation10 + $0x38] sm:$0xff]  }
 0x148   :  { %v1425_v13 = vpop.f32.mrf.mxu1  ;;  %2146 = vmatprep.subr.bf16.mxu1 %v3060_v3  ;;  %v3070_v3 = vld [vmem:[#allocation10 + $0x60] sm:$0xff]  }
 0x14a   :  { %v1502_v42 = vpop.f32.mrf.mxu1 }
 0x14b   :  { %2147 = vmatpush2.bf16.msra.mxu1 %v3058_v50  ;;  %v3071_v50 = vld [vmem:[#allocation10 + $0x20] sm:$0xff]  }
 0x14c   :  { %v1504_v46 = vpop.f32.mrf.mxu1  ;;  %2148 = vmatprep.subr.bf16.mxu1 %v3063_v51  ;;  %v3072_v51 = vld [vmem:[#allocation10 + $0x58] sm:$0xff]  }
 0x14e   :  { %v1506_v47 = vpop.f32.mrf.mxu1 }
 0x14f   :  { %2149 = vmatpush2.bf16.msra.mxu1 %v3061_v52  ;;  %v3068_v47 = vld [vmem:[#allocation10 + $0x68] sm:$0xff]   ;;  %v3073_v52 = vld [vmem:[#allocation10 + $0x18] sm:$0xff]  }
 0x150   :  { %v1507_v49 = vpop.f32.mrf.mxu1 }
 0x151   :  { %v3069_v49 = vld [vmem:[#allocation10 + $0x28] sm:$0xff]  }
 0x181   :  { %v1461_v57 = vpop.f32.mrf.mxu0 }
 0x182   :  { %v1462_v31 = vadd.f32 %v1461_v57, %v1421_v26  ;;  %v3079_v26 = vld [vmem:[#allocation10] sm:$0xff]  }
 0x183   :  { %v1463_v59 = vpop.f32.mrf.mxu0 }
 0x184   :  { %v1503_v60 = vadd.f32 %v1502_v42, %v1462_v31  ;;  %v1464_v61 = vadd.f32 %v1463_v59, %v1423_v58 }
 0x185   :  { %v1465_v62 = vpop.f32.mrf.mxu0 }
 0x186   :  { %v1505_v63 = vadd.f32 %v1504_v46, %v1464_v61  ;;  %v1673_v0 = vmax.f32 %v1503_v60, 0.0  ;;  %v1745_v60 = vld [vmem:[%s3349_s4] sm:$0x3] }
 0x187   :  { %v1466_v1 = vpop.f32.mrf.mxu0  ;;  %v1750_v61 = vrot.slane %v1745_v60, %v343_v19  ;;  %v1754_v62 = vrot.slane %v1745_v60, %v347_v53 }
 0x188   :  { %v1674_v2 = vmax.f32 %v1505_v63, 0.0  ;;  %v1677_v6 = vpack.c.bf16 %v1673_v0, %v1673_v0 }
 0x18a   :  { %v1543_v4 = vpop.f32.mrf.mxu1  ;;  %v1678_v5 = vpack.c.bf16 %v1674_v2, %v1674_v2 }
 0x18b   :  { %v1544_v23 = vadd.f32 %v1543_v4, %v352_v17 }
 0x18c   :  { %v1545_v7 = vpop.f32.mrf.mxu1  ;;  %2109 = vmatprep.mubr.bf16.mxu0 %v1678_v5 }
 0x18d   :  { %2110 = vmatmul.mubr.bf16.vlgmr.msra.gmra.mxu0 %v1677_v6  ;;  %v1546_v25 = vadd.f32 %v1545_v7, %v356_v21 }
 0x18e   :  { %v1547_v8 = vpop.f32.mrf.mxu1  ;;  %2637 = vmatpush3.bf16.msra.mxu0 %v3065_v39 }
 0x18f   :  { %2638 = vmatprep.subr.bf16.mxu0 %v3066_v40 }
 0x190   :  { %v1548_v9 = vpop.f32.mrf.mxu1 }
 0x192   :  { %2639 = vmatpush3.bf16.msra.mxu0 %v3067_v45 }
 0x193   :  { %2640 = vmatprep.subr.bf16.mxu0 %v3068_v47 }
 0x196   :  { %2641 = vmatpush3.bf16.msra.mxu0 %v3069_v49 }
 0x197   :  { %2642 = vmatprep.subr.bf16.mxu0 %v3070_v3 }
 0x19a   :  { %2643 = vmatpush3.bf16.msra.mxu0 %v3071_v50 }
 0x19b   :  { %2644 = vmatprep.subr.bf16.mxu0 %v3072_v51 }
 0x19e   :  { %2645 = vmatpush3.bf16.msra.mxu0 %v3073_v52 }
 0x19f   :  { %2646 = vmatprep.subr.bf16.mxu0 %v3074_v32 }
 0x1a2   :  { %2647 = vmatpush3.bf16.msra.mxu0 %v3075_v29 }
 0x1a3   :  { %2648 = vmatprep.subr.bf16.mxu0 %v3076_v54 }
 0x1a6   :  { %2649 = vmatpush3.bf16.msra.mxu0 %v3077_v55 }
 0x1a7   :  { %2650 = vmatprep.subr.bf16.mxu0 %v3078_v56 }
 0x1aa   :  { %2651 = vmatpush3.bf16.msra.mxu0 %v3079_v26 }
 0x1c1   :  { %v1584_v10 = vpop.f32.mrf.mxu0 }
 0x1c2   :  { %v1585_v27 = vadd.f32 %v1584_v10, %v1544_v23 }
 0x1c3   :  { %v1586_v11 = vpop.f32.mrf.mxu0 }
 0x1c4   :  { %v1587_v30 = vadd.f32 %v1586_v11, %v1546_v25 }
 0x1c5   :  { %v1588_v14 = vpop.f32.mrf.mxu0 }
 0x1c7   :  { %v1589_v16 = vpop.f32.mrf.mxu0 }
 0x1ca   :  { %v1625_v18 = vpop.f32.mrf.mxu1 }
 0x1cb   :  { %v1626_v33 = vadd.f32 %v1625_v18, %v1585_v27 }
 0x1cc   :  { %v1627_v22 = vpop.f32.mrf.mxu1 }
 0x1cd   :  { %v1628_v35 = vadd.f32 %v1627_v22, %v1587_v30 }
 0x1ce   :  { %v1629_v24 = vpop.f32.mrf.mxu1 }
 0x1d0   :  { %v1630_v28 = vpop.f32.mrf.mxu1 }
 0x1d2   :  { %v1666_v34 = vpop.f32.mrf.mxu1 }
 0x1d3   :  { %v1667_v36 = vadd.f32 %v1666_v34, %v1626_v33 }
 0x1d4   :  { %v1668_v37 = vpop.f32.mrf.mxu1 }
 0x1d5   :  { %v1669_v13 = vadd.f32 %v1668_v37, %v1628_v35  ;;  %v1675_v41 = vmax.f32 %v1667_v36, 0.0 }
 0x1d6   :  { %v1670_v42 = vpop.f32.mrf.mxu1 }
 0x1d7   :  { %v1676_v44 = vmax.f32 %v1669_v13, 0.0  ;;  %v1679_v20 = vpack.c.bf16 %v1675_v41, %v1675_v41 }
 0x1d8   :  { %v1671_v46 = vpop.f32.mrf.mxu1 }
 0x1d9   :  { %v1680_v48 = vpack.c.bf16 %v1676_v44, %v1676_v44 }
 0x1db   :  { %2150 = vmatprep.mubr.bf16.mxu1 %v1680_v48 }
 0x1dc   :  { %2151 = vmatmul.mubr.bf16.vlgmr.msra.gmra.mxu1 %v1679_v20 }
 0x24d   :  { %v2111_v57 = vpop.f32.mrf.mxu0 }
 0x24e   :  { %v2112_v63 = vadd.f32 %v2111_v57, %v1750_v61 }
 0x24f   :  { %v2113_v58 = vpop.f32.mrf.mxu0 }
 0x250   :  { %v2114_v1 = vadd.f32 %v2113_v58, %v1754_v62 }
 0x251   :  { %v2115_v31 = vpop.f32.mrf.mxu0 }
 0x253   :  { %v2116_v59 = vpop.f32.mrf.mxu0 }
 0x29c   :  { %v2152_v0 = vpop.f32.mrf.mxu1 }
 0x29d   :  { %v2153_v2 = vadd.f32 %v2152_v0, %v2112_v63 }
 0x29e   :  { %v2154_v4 = vpop.f32.mrf.mxu1 }
 0x29f   :  { %v2155_v5 = vadd.f32 %v2154_v4, %v2114_v1  ;;  %v2159_v6 = vmax.f32 %v2153_v2, 0.0 }
 0x2a0   :  { %v2156_v7 = vpop.f32.mrf.mxu1 }
 0x2a1   :  { %v2160_v8 = vmax.f32 %v2155_v5, 0.0  ;;  %v2161_v11 = vpack.c.bf16 %v2159_v6, %v2159_v6 }
 0x2a2   :  { %v2157_v9 = vpop.f32.mrf.mxu1 }
 0x2a3   :  { %v2162_v10 = vpack.c.bf16 %v2160_v8, %v2160_v8 }
 0x2a5   :  { %2330 = vmatprep.mubr.bf16.mxu0 %v2162_v10 }
 0x2a6   :  { %2331 = vmatmul.mubr.bf16.vlgmr.msra.gmra.mxu0 %v2161_v11 }
 0x366   :  { %v2652_v12 = vpop.f32.mrf.mxu0 }
 0x368   :  { %v2653_v19 = vpop.f32.mrf.mxu0 }
 0x369   :  { %v2654_v53 = vadd.f32 %v2653_v19, %v2652_v12 }
 0x36a   :  { %v2655_v14 = vpop.f32.mrf.mxu0 }
 0x36b   :  { %v2333_v15 = vadd.f32 %v2654_v53, %v2619_v43 }
 0x36c   :  { %v2656_v16 = vpop.f32.mrf.mxu0 }
 0x36d   :  { %v2338_v17 = vmax.f32 %v2333_v15, 0.0 }
 0x36f   :  { %2339 = vst [vmem:[#allocation11] sm:$0x3] %v2338_v17 }
 0x370   :  { %3191 = shalt.err (!%p3188_p1)
}
 0x371   :  { %2349 = dma.vmem_to_hbm [thread:$0]  %s2347_s8, 32, %s3352_s7, [#allocation4]  }
 0x372   :  { %3206 = dma.done.wait [#allocation4], 32  }
 0x373   :  { %3207 = vsyncadd [#allocation4], 4294967264 }
 0x374   :  { %2353 = vsyncpa [#allocation3], 1 }
 0x375   :  { %2354 = vsyncpa [#allocation6], 1 }
 0x376   :  { %2355 = vsyncpa [#allocation9], 1 }
 0x377   :  { %2356 = vsyncpa [#allocation4], 1 }

</bundles_post_ra>
